<compile_context>
chip_gen: v7x
topology: tpu7x:2x2x1
jax: 0.10.0
libtpu: 0.0.40
codegen_flags: <defaults>
</compile_context>

<pallas_src>
import math
from functools import partial

import jax
import jax.numpy as jnp
from jax.experimental import pallas as pl
from jax.experimental.pallas import tpu as pltpu


def _round_up(x, m):
    return (x + m - 1) // m * m


# ---------------------------------------------------------------------------
# Pallas kernels
# ---------------------------------------------------------------------------
def _conv_gemm_kernel(x_ref, w_ref, b_ref, o_ref, acc_ref):
    """Tiled im2col GEMM: (TM, TK) @ (TK, TN), f32 accumulate, bias epilogue."""
    k = pl.program_id(2)

    @pl.when(k == 0)
    def _():
        acc_ref[...] = jnp.zeros_like(acc_ref)

    acc_ref[...] += jnp.dot(x_ref[...], w_ref[...],
                            preferred_element_type=jnp.float32)

    @pl.when(k == pl.num_programs(2) - 1)
    def _():
        o_ref[...] = (acc_ref[...] + b_ref[...]).astype(o_ref.dtype)


def _stft_mag_kernel(fr_ref, cos_ref, nsin_ref, mag_ref, log_ref, *, inv_norm):
    """Framed real DFT tile: frames (TM, win) @ cos / -sin (win, TN).

    Writes linear magnitude and log magnitude to two lane-padded outputs.
    Log is computed as 0.5*log(re^2+im^2+eps) to break the sqrt->log chain.
    """
    x = fr_ref[...]
    re = jnp.dot(x, cos_ref[...], preferred_element_type=jnp.float32)
    im = jnp.dot(x, nsin_ref[...], preferred_element_type=jnp.float32)
    sq = re * re + im * im + 1e-9
    mag_ref[...] = jnp.sqrt(sq) * inv_norm
    log_ref[...] = 0.5 * jnp.log(sq) + math.log(inv_norm)


# ---------------------------------------------------------------------------
# Tiled GEMM + bias wrapper (bf16 operands, f32 accumulation / output)
# ---------------------------------------------------------------------------
def _gemm_bias(xc, wk, b, M, K, N):
    """xc: (M, K) bf16, wk: (K, N) bf16, b: (N,) f32 -> (M, N) f32."""
    TM = min(256, _round_up(M, 8))
    M_pad = _round_up(M, TM)

    N_pad = _round_up(N, 128)
    TN = 128 if N_pad <= 128 else 256
    N_pad = _round_up(N_pad, TN)

    if K <= 1152:                       # single full-extent K block, no padding
        TK, K_pad, nk = K, K, 1
    else:                               # split K into ~1152-wide 128-aligned tiles
        K_pad = _round_up(K, 128)
        nk = -(-K_pad // 1152)
        TK = _round_up(-(-K_pad // nk), 128)
        K_pad = TK * nk

    xc = jnp.pad(xc, ((0, M_pad - M), (0, K_pad - K)))
    wk = jnp.pad(wk, ((0, K_pad - K), (0, N_pad - N)))
    bb = jnp.pad(b.astype(jnp.float32), (0, N_pad - N)).reshape(1, N_pad)

    grid = (M_pad // TM, N_pad // TN, nk)
    out = pl.pallas_call(
        _conv_gemm_kernel,
        out_shape=jax.ShapeDtypeStruct((M_pad, N_pad), jnp.float32),
        grid_spec=pltpu.PrefetchScalarGridSpec(
            num_scalar_prefetch=0,
            grid=grid,
            in_specs=[
                pl.BlockSpec((TM, TK), lambda i, j, k: (i, k)),
                pl.BlockSpec((TK, TN), lambda i, j, k: (k, j)),
                pl.BlockSpec((1, TN), lambda i, j, k: (0, j)),
            ],
            out_specs=pl.BlockSpec((TM, TN), lambda i, j, k: (i, j)),
            scratch_shapes=[pltpu.VMEM((TM, TN), jnp.float32)],
        ),
        compiler_params=pltpu.CompilerParams(
            dimension_semantics=("parallel", "parallel", "arbitrary"),
            vmem_limit_bytes=32 * 1024 * 1024,
        ),
        cost_estimate=pl.CostEstimate(
            flops=2 * M_pad * K_pad * N_pad,
            transcendentals=0,
            bytes_accessed=(M_pad * K_pad + K_pad * N_pad) * 2
            + M_pad * N_pad * 4,
        ),
    )(xc, wk, bb)
    return out[:M, :N]


# ---------------------------------------------------------------------------
# Conv2d(3x3) + ReflectionPad2d(1) via im2col + tiled Pallas GEMM
# ---------------------------------------------------------------------------
def conv2d_3x3_reflect(x_nhwc, w, b, stride):
    """x_nhwc: (B, H, W, Cin) f32; w: (3, 3, Cin, Cout); b: (Cout,)."""
    B, H, W, Cin = x_nhwc.shape
    Cout = w.shape[-1]
    xp = jnp.pad(x_nhwc, ((0, 0), (1, 1), (1, 1), (0, 0)),
                 mode="reflect").astype(jnp.bfloat16)
    Ho = (H - 1) // stride + 1
    Wo = (W - 1) // stride + 1

    # im2col (indexing glue only).
    # TODO(synk): halo'd in-kernel im2col (manual DMA) would cut HBM traffic
    #   ~9x; overlapping blocks are not expressible with Blocked BlockSpecs.
    cols = []
    for dy in range(3):
        for dx in range(3):
            patch = jax.lax.slice(
                xp,
                (0, dy, dx, 0),
                (B, dy + (Ho - 1) * stride + 1, dx + (Wo - 1) * stride + 1, Cin),
                (1, stride, stride, 1),
            )  # (B, Ho, Wo, Cin)
            cols.append(patch)
    xc = jnp.stack(cols, axis=3).reshape(B * Ho * Wo, 9 * Cin)
    wk = w.reshape(9 * Cin, Cout).astype(jnp.bfloat16)

    out = _gemm_bias(xc, wk, b, B * Ho * Wo, 9 * Cin, Cout)
    return out.reshape(B, Ho, Wo, Cout)


# ---------------------------------------------------------------------------
# STFT magnitude ('double' domain) via framing + gridded Pallas DFT matmul
# ---------------------------------------------------------------------------
def stft_mag_double(x, fft_size, hop_size):
    """x: (B, T) waveform -> (B, F, n_frames, 2) NHWC [linear, log] magnitude."""
    B, T = x.shape
    win = fft_size
    n_bins = fft_size // 2 + 1
    pad = fft_size // 2

    xp = jnp.pad(x, ((0, 0), (pad, pad)), mode="reflect")       # center=True
    n_frames = 1 + T // hop_size
    idx = jnp.arange(n_frames)[:, None] * hop_size + jnp.arange(win)[None, :]
    frames = xp[:, idx].astype(jnp.bfloat16)                    # (B, n_frames, win)
    # TODO(synk): frame extraction still materializes the 4x-overlapped frame
    #   tensor in HBM; in-kernel strided-DMA framing needs manual make_async_copy.

    F_pad = _round_up(n_bins, 128)
    TN = 128 if F_pad <= 128 else 256
    F_pad = _round_up(F_pad, TN)

    n = jnp.arange(win, dtype=jnp.float32)[:, None]
    k = jnp.arange(F_pad, dtype=jnp.float32)[None, :]
    valid = (k < n_bins).astype(jnp.float32)                    # zero padded bins
    ang = 2.0 * math.pi * n * k / fft_size
    window = 0.5 - 0.5 * jnp.cos(2.0 * math.pi *
                                 jnp.arange(win, dtype=jnp.float32) / win)  # hann
    cos_m = (jnp.cos(ang) * valid * window[:, None]).astype(jnp.bfloat16)
    nsin_m = (-jnp.sin(ang) * valid * window[:, None]).astype(jnp.bfloat16)

    Mf = B * n_frames
    TM = min(256, _round_up(Mf, 8))
    Mf_pad = _round_up(Mf, TM)
    fr = jnp.pad(frames.reshape(Mf, win), ((0, Mf_pad - Mf), (0, 0)))

    grid = (Mf_pad // TM, F_pad // TN)
    mag, logmag = pl.pallas_call(
        partial(_stft_mag_kernel, inv_norm=1.0 / math.sqrt(win)),  # normalized=True
        out_shape=(jax.ShapeDtypeStruct((Mf_pad, F_pad), jnp.float32),
                   jax.ShapeDtypeStruct((Mf_pad, F_pad), jnp.float32)),
        grid_spec=pltpu.PrefetchScalarGridSpec(
            num_scalar_prefetch=0,
            grid=grid,
            in_specs=[
                pl.BlockSpec((TM, win), lambda i, j: (i, 0)),
                pl.BlockSpec((win, TN), lambda i, j: (0, j)),
                pl.BlockSpec((win, TN), lambda i, j: (0, j)),
            ],
            out_specs=[
                pl.BlockSpec((TM, TN), lambda i, j: (i, j)),
                pl.BlockSpec((TM, TN), lambda i, j: (i, j)),
            ],
        ),
        compiler_params=pltpu.CompilerParams(
            dimension_semantics=("parallel", "parallel"),
            vmem_limit_bytes=32 * 1024 * 1024,
        ),
        cost_estimate=pl.CostEstimate(
            flops=4 * Mf_pad * win * F_pad,
            transcendentals=2 * Mf_pad * F_pad,
            bytes_accessed=(Mf_pad * win + 2 * win * F_pad) * 2
            + 2 * Mf_pad * F_pad * 4,
        ),
    )(fr, cos_m, nsin_m)

    mag = mag[:Mf, :n_bins].reshape(B, n_frames, n_bins)
    logmag = logmag[:Mf, :n_bins].reshape(B, n_frames, n_bins)
    # PyTorch: (B, 2F, T) -> chunk/stack -> (B, 2, F, T); here NHWC (B, F, T, 2)
    return jnp.stack([mag, logmag], axis=-1).transpose(0, 2, 1, 3)


# ---------------------------------------------------------------------------
# DiscriminatorR / MultiResolutionDiscriminator
# ---------------------------------------------------------------------------
_STRIDES = (1, 2, 1, 2, 1, 2, 1)


def init_discriminator_r(key, in_channels, hidden_channels):
    h = hidden_channels
    chans = [in_channels, h // 32, h // 16, h // 8, h // 4, h // 2, h, 1]
    params = []
    for i in range(7):
        key, kw, kb = jax.random.split(key, 3)
        cin, cout = chans[i], chans[i + 1]
        # weight_norm only reparametrizes the conv weight; the effective forward
        # weight is initialized directly (deterministic synthetic init).
        w = jax.random.normal(kw, (3, 3, cin, cout), jnp.float32) / math.sqrt(9 * cin)
        b = 0.01 * jax.random.normal(kb, (cout,), jnp.float32)
        params.append((w, b))
    return params, key


def discriminator_r_forward(params, x_nhwc):
    hiddens = []
    x = x_nhwc
    for i, (w, b) in enumerate(params):
        # LeakyReLU(0.2) applied once on the non-duplicated conv output
        # (hiddens stay pre-activation, matching the PyTorch module).
        inp = x if i == 0 else jnp.where(x >= 0, x, 0.2 * x)
        x = conv2d_3x3_reflect(inp, w, b, _STRIDES[i])
        hiddens.append(x)
    return x, hiddens[:-1]


@partial(jax.jit, static_argnums=(2,))
def _resolution_forward(params, xs, hop):
    mag = stft_mag_double(xs, fft_size=hop * 4, hop_size=hop)    # (B, F, T, 2)
    score, hidden = discriminator_r_forward(params, mag)
    score = jnp.transpose(score, (0, 3, 1, 2))                   # NCHW
    hidden = [jnp.transpose(h, (0, 3, 1, 2)) for h in hidden]
    return score, hidden


class MultiResolutionDiscriminatorPallas:
    def __init__(self, hop_lengths, hidden_channels, domain="double",
                 key=jax.random.PRNGKey(42)):
        assert domain == "double"
        self.hop_lengths = list(hop_lengths)
        self.domain = domain
        self.params = []
        for hc in hidden_channels:
            p, key = init_discriminator_r(key, 2, hc)
            self.params.append(p)

    def __call__(self, x):
        # x: (B, 1, T) like the PyTorch module; avoid jnp.squeeze pitfalls.
        if x.ndim == 3:
            xs = x[:, 0, :]
        elif x.ndim == 2:
            xs = x
        else:
            xs = x.reshape(1, -1)
        scores, feats = [], []
        for hop, params in zip(self.hop_lengths, self.params):
            score, hidden = _resolution_forward(params, xs, hop)
            scores.append(score)
            feats.append(hidden)
        return scores, feats


# ---------------------------------------------------------------------------
if __name__ == "__main__":
    key = jax.random.PRNGKey(0)
    B, T = 2, 240
    x = jax.random.normal(key, (B, 1, T), dtype=jnp.float32)

    # Small-resolution instance consistent with the module's constructor
    # (hop_lengths / hidden_channels lists, domain='double').
    model = MultiResolutionDiscriminatorPallas(
        hop_lengths=[4, 8],
        hidden_channels=[64, 64],
        domain="double",
        key=jax.random.PRNGKey(1),
    )

    scores, feats = model(x)
    jax.block_until_ready((scores, feats))

    assert len(scores) == 2 and len(feats) == 2
    for s, f in zip(scores, feats):
        assert s.shape[0] == B and s.shape[1] == 1        # (B, 1, Hf, Wf)
        assert len(f) == 6                                # hiddens[:-1]
        for h in f:
            assert jnp.all(jnp.isfinite(h))
    print("KERNEL_OK")
</pallas_src>

<mosaic_0001>
module attributes {stable_mosaic.version = 11 : i64} {
  func.func @_stft_mag_kernel(%arg0: i32, %arg1: i32, %arg2: memref<128x16xbf16, #tpu.memory_space<vmem>>, %arg3: memref<16x128xbf16, #tpu.memory_space<vmem>>, %arg4: memref<16x128xbf16, #tpu.memory_space<vmem>>, %arg5: memref<128x128xf32, #tpu.memory_space<vmem>>, %arg6: memref<128x128xf32, #tpu.memory_space<vmem>>) attributes {dimension_semantics = [#tpu.dimension_semantics<parallel>, #tpu.dimension_semantics<parallel>], iteration_bounds = array<i64: 1, 1>, scalar_prefetch = 0 : i64, scratch_operands = 0 : i64, tpu.core_type = #tpu.core_type<tc>, window_params = [{transform_indices = @transform_0, window_bounds = array<i64: 128, 16>}, {transform_indices = @transform_1, window_bounds = array<i64: 16, 128>}, {transform_indices = @transform_2, window_bounds = array<i64: 16, 128>}, {transform_indices = @transform_3, window_bounds = array<i64: 128, 128>}, {transform_indices = @transform_4, window_bounds = array<i64: 128, 128>}]} {
    %c0 = arith.constant 0 : index
    %c0_0 = arith.constant 0 : index
    %0 = vector.load %arg2[%c0, %c0_0] : memref<128x16xbf16, #tpu.memory_space<vmem>>, vector<128x16xbf16>
    %c0_1 = arith.constant 0 : index
    %c0_2 = arith.constant 0 : index
    %1 = vector.load %arg3[%c0_1, %c0_2] : memref<16x128xbf16, #tpu.memory_space<vmem>>, vector<16x128xbf16>
    %cst = arith.constant dense<0.000000e+00> : vector<128x128xf32>
    %2 = tpu.matmul %0, %1, %cst {dimension_numbers = #tpu.dot_dimension_numbers<[1], [0], [0], [1], [0, 0, 1, 1], [], []>} : vector<128x16xbf16>, vector<16x128xbf16>, vector<128x128xf32> -> vector<128x128xf32>
    %c0_3 = arith.constant 0 : index
    %c0_4 = arith.constant 0 : index
    %3 = vector.load %arg4[%c0_3, %c0_4] : memref<16x128xbf16, #tpu.memory_space<vmem>>, vector<16x128xbf16>
    %cst_5 = arith.constant dense<0.000000e+00> : vector<128x128xf32>
    %4 = tpu.matmul %0, %3, %cst_5 {dimension_numbers = #tpu.dot_dimension_numbers<[1], [0], [0], [1], [0, 0, 1, 1], [], []>} : vector<128x16xbf16>, vector<16x128xbf16>, vector<128x128xf32> -> vector<128x128xf32>
    %5 = arith.mulf %2, %2 : vector<128x128xf32>
    %6 = arith.mulf %4, %4 : vector<128x128xf32>
    %7 = arith.addf %5, %6 : vector<128x128xf32>
    %cst_6 = arith.constant 9.99999971E-10 : f32
    %8 = vector.broadcast %cst_6 : f32 to vector<128x128xf32>
    %9 = arith.addf %7, %8 : vector<128x128xf32>
    %10 = math.sqrt %9 : vector<128x128xf32>
    %cst_7 = arith.constant 2.500000e-01 : f32
    %11 = vector.broadcast %cst_7 : f32 to vector<128x128xf32>
    %12 = arith.mulf %10, %11 : vector<128x128xf32>
    %c0_8 = arith.constant 0 : index
    %c0_9 = arith.constant 0 : index
    %13 = vector.load %arg5[%c0_8, %c0_9] : memref<128x128xf32, #tpu.memory_space<vmem>>, vector<128x128xf32>
    tpu.vector_store %arg5[%c0_8, %c0_9], %12 {strides = array<i32>} : memref<128x128xf32, #tpu.memory_space<vmem>>, vector<128x128xf32>,
    %14 = math.log %9 : vector<128x128xf32>
    %cst_10 = arith.constant 5.000000e-01 : f32
    %15 = vector.broadcast %cst_10 : f32 to vector<128x128xf32>
    %16 = arith.mulf %15, %14 : vector<128x128xf32>
    %cst_11 = arith.constant -1.38629436 : f32
    %17 = vector.broadcast %cst_11 : f32 to vector<128x128xf32>
    %18 = arith.addf %16, %17 : vector<128x128xf32>
    %c0_12 = arith.constant 0 : index
    %c0_13 = arith.constant 0 : index
    %19 = vector.load %arg6[%c0_12, %c0_13] : memref<128x128xf32, #tpu.memory_space<vmem>>, vector<128x128xf32>
    tpu.vector_store %arg6[%c0_12, %c0_13], %18 {strides = array<i32>} : memref<128x128xf32, #tpu.memory_space<vmem>>, vector<128x128xf32>,
    return
  }
  func.func @transform_0(%arg0: i32, %arg1: i32) -> (i32, i32) {
    %c0_i32 = arith.constant 0 : i32
    %c0_i32_0 = arith.constant 0 : i32
    return %arg0, %c0_i32 : i32, i32
  }
  func.func @transform_1(%arg0: i32, %arg1: i32) -> (i32, i32) {
    %c0_i32 = arith.constant 0 : i32
    %c0_i32_0 = arith.constant 0 : i32
    return %c0_i32, %arg1 : i32, i32
  }
  func.func @transform_2(%arg0: i32, %arg1: i32) -> (i32, i32) {
    %c0_i32 = arith.constant 0 : i32
    %c0_i32_0 = arith.constant 0 : i32
    return %c0_i32, %arg1 : i32, i32
  }
  func.func @transform_3(%arg0: i32, %arg1: i32) -> (i32, i32) {
    %c0_i32 = arith.constant 0 : i32
    return %arg0, %arg1 : i32, i32
  }
  func.func @transform_4(%arg0: i32, %arg1: i32) -> (i32, i32) {
    %c0_i32 = arith.constant 0 : i32
    return %arg0, %arg1 : i32, i32
  }
}

module attributes {stable_mosaic.version = 11 : i64} {
  func.func @_conv_gemm_kernel(%arg0: i32, %arg1: i32, %arg2: i32, %arg3: memref<256x18xbf16, #tpu.memory_space<vmem>>, %arg4: memref<18x128xbf16, #tpu.memory_space<vmem>>, %arg5: memref<1x128xf32, #tpu.memory_space<vmem>>, %arg6: memref<256x128xf32, #tpu.memory_space<vmem>>, %arg7: memref<256x128xf32, #tpu.memory_space<vmem>>) attributes {dimension_semantics = [#tpu.dimension_semantics<parallel>, #tpu.dimension_semantics<parallel>, #tpu.dimension_semantics<arbitrary>], iteration_bounds = array<i64: 5, 1, 1>, scalar_prefetch = 0 : i64, scratch_operands = 1 : i64, tpu.core_type = #tpu.core_type<tc>, window_params = [{transform_indices = @transform_0, window_bounds = array<i64: 256, 18>}, {transform_indices = @transform_1, window_bounds = array<i64: 18, 128>}, {transform_indices = @transform_2, window_bounds = array<i64: 1, 128>}, {transform_indices = @transform_3, window_bounds = array<i64: 256, 128>}]} {
    %c0_i32 = arith.constant 0 : i32
    %0 = arith.cmpi eq, %arg2, %c0_i32 : i32
    %1 = arith.extui %0 : i1 to i32
    %c0_i32_0 = arith.constant 0 : i32
    %2 = arith.cmpi ne, %1, %c0_i32_0 : i32
    scf.if %2 {
      %cst_10 = arith.constant 0.000000e+00 : f32
      %12 = vector.broadcast %cst_10 : f32 to vector<256x128xf32>
      %c0_11 = arith.constant 0 : index
      %c0_12 = arith.constant 0 : index
      %13 = vector.load %arg7[%c0_11, %c0_12] : memref<256x128xf32, #tpu.memory_space<vmem>>, vector<256x128xf32>
      tpu.vector_store %arg7[%c0_11, %c0_12], %12 {strides = array<i32>} : memref<256x128xf32, #tpu.memory_space<vmem>>, vector<256x128xf32>,
    } else {
    }
    %c0 = arith.constant 0 : index
    %c0_1 = arith.constant 0 : index
    %3 = vector.load %arg7[%c0, %c0_1] : memref<256x128xf32, #tpu.memory_space<vmem>>, vector<256x128xf32>
    %c0_2 = arith.constant 0 : index
    %c0_3 = arith.constant 0 : index
    %4 = vector.load %arg3[%c0_2, %c0_3] : memref<256x18xbf16, #tpu.memory_space<vmem>>, vector<256x18xbf16>
    %c0_4 = arith.constant 0 : index
    %c0_5 = arith.constant 0 : index
    %5 = vector.load %arg4[%c0_4, %c0_5] : memref<18x128xbf16, #tpu.memory_space<vmem>>, vector<18x128xbf16>
    %cst = arith.constant dense<0.000000e+00> : vector<256x128xf32>
    %6 = tpu.matmul %4, %5, %cst {dimension_numbers = #tpu.dot_dimension_numbers<[1], [0], [0], [1], [0, 0, 1, 1], [], []>} : vector<256x18xbf16>, vector<18x128xbf16>, vector<256x128xf32> -> vector<256x128xf32>
    %7 = arith.addf %3, %6 : vector<256x128xf32>
    %c0_6 = arith.constant 0 : index
    %c0_7 = arith.constant 0 : index
    %8 = vector.load %arg7[%c0_6, %c0_7] : memref<256x128xf32, #tpu.memory_space<vmem>>, vector<256x128xf32>
    tpu.vector_store %arg7[%c0_6, %c0_7], %7 {strides = array<i32>} : memref<256x128xf32, #tpu.memory_space<vmem>>, vector<256x128xf32>,
    %c0_i32_8 = arith.constant 0 : i32
    %9 = arith.cmpi eq, %arg2, %c0_i32_8 : i32
    %10 = arith.extui %9 : i1 to i32
    %c0_i32_9 = arith.constant 0 : i32
    %11 = arith.cmpi ne, %10, %c0_i32_9 : i32
    scf.if %11 {
      %c0_10 = arith.constant 0 : index
      %c0_11 = arith.constant 0 : index
      %12 = vector.load %arg7[%c0_10, %c0_11] : memref<256x128xf32, #tpu.memory_space<vmem>>, vector<256x128xf32>
      %c0_12 = arith.constant 0 : index
      %c0_13 = arith.constant 0 : index
      %13 = vector.load %arg5[%c0_12, %c0_13] : memref<1x128xf32, #tpu.memory_space<vmem>>, vector<1x128xf32>
      %14 = vector.broadcast %13 : vector<1x128xf32> to vector<256x128xf32>
      %15 = arith.addf %12, %14 : vector<256x128xf32>
      %c0_14 = arith.constant 0 : index
      %c0_15 = arith.constant 0 : index
      %16 = vector.load %arg6[%c0_14, %c0_15] : memref<256x128xf32, #tpu.memory_space<vmem>>, vector<256x128xf32>
      tpu.vector_store %arg6[%c0_14, %c0_15], %15 {strides = array<i32>} : memref<256x128xf32, #tpu.memory_space<vmem>>, vector<256x128xf32>,
    } else {
    }
    return
  }
  func.func @transform_0(%arg0: i32, %arg1: i32, %arg2: i32) -> (i32, i32) {
    %c0_i32 = arith.constant 0 : i32
    return %arg0, %arg2 : i32, i32
  }
  func.func @transform_1(%arg0: i32, %arg1: i32, %arg2: i32) -> (i32, i32) {
    %c0_i32 = arith.constant 0 : i32
    return %arg2, %arg1 : i32, i32
  }
  func.func @transform_2(%arg0: i32, %arg1: i32, %arg2: i32) -> (i32, i32) {
    %c0_i32 = arith.constant 0 : i32
    %c0_i32_0 = arith.constant 0 : i32
    return %c0_i32, %arg1 : i32, i32
  }
  func.func @transform_3(%arg0: i32, %arg1: i32, %arg2: i32) -> (i32, i32) {
    %c0_i32 = arith.constant 0 : i32
    return %arg0, %arg1 : i32, i32
  }
}

module attributes {stable_mosaic.version = 11 : i64} {
  func.func @_conv_gemm_kernel(%arg0: i32, %arg1: i32, %arg2: i32, %arg3: memref<256x18xbf16, #tpu.memory_space<vmem>>, %arg4: memref<18x128xbf16, #tpu.memory_space<vmem>>, %arg5: memref<1x128xf32, #tpu.memory_space<vmem>>, %arg6: memref<256x128xf32, #tpu.memory_space<vmem>>, %arg7: memref<256x128xf32, #tpu.memory_space<vmem>>) attributes {dimension_semantics = [#tpu.dimension_semantics<parallel>, #tpu.dimension_semantics<parallel>, #tpu.dimension_semantics<arbitrary>], iteration_bounds = array<i64: 2, 1, 1>, scalar_prefetch = 0 : i64, scratch_operands = 1 : i64, tpu.core_type = #tpu.core_type<tc>, window_params = [{transform_indices = @transform_0, window_bounds = array<i64: 256, 18>}, {transform_indices = @transform_1, window_bounds = array<i64: 18, 128>}, {transform_indices = @transform_2, window_bounds = array<i64: 1, 128>}, {transform_indices = @transform_3, window_bounds = array<i64: 256, 128>}]} {
    %c0_i32 = arith.constant 0 : i32
    %0 = arith.cmpi eq, %arg2, %c0_i32 : i32
    %1 = arith.extui %0 : i1 to i32
    %c0_i32_0 = arith.constant 0 : i32
    %2 = arith.cmpi ne, %1, %c0_i32_0 : i32
    scf.if %2 {
      %cst_10 = arith.constant 0.000000e+00 : f32
      %12 = vector.broadcast %cst_10 : f32 to vector<256x128xf32>
      %c0_11 = arith.constant 0 : index
      %c0_12 = arith.constant 0 : index
      %13 = vector.load %arg7[%c0_11, %c0_12] : memref<256x128xf32, #tpu.memory_space<vmem>>, vector<256x128xf32>
      tpu.vector_store %arg7[%c0_11, %c0_12], %12 {strides = array<i32>} : memref<256x128xf32, #tpu.memory_space<vmem>>, vector<256x128xf32>,
    } else {
    }
    %c0 = arith.constant 0 : index
    %c0_1 = arith.constant 0 : index
    %3 = vector.load %arg7[%c0, %c0_1] : memref<256x128xf32, #tpu.memory_space<vmem>>, vector<256x128xf32>
    %c0_2 = arith.constant 0 : index
    %c0_3 = arith.constant 0 : index
    %4 = vector.load %arg3[%c0_2, %c0_3] : memref<256x18xbf16, #tpu.memory_space<vmem>>, vector<256x18xbf16>
    %c0_4 = arith.constant 0 : index
    %c0_5 = arith.constant 0 : index
    %5 = vector.load %arg4[%c0_4, %c0_5] : memref<18x128xbf16, #tpu.memory_space<vmem>>, vector<18x128xbf16>
    %cst = arith.constant dense<0.000000e+00> : vector<256x128xf32>
    %6 = tpu.matmul %4, %5, %cst {dimension_numbers = #tpu.dot_dimension_numbers<[1], [0], [0], [1], [0, 0, 1, 1], [], []>} : vector<256x18xbf16>, vector<18x128xbf16>, vector<256x128xf32> -> vector<256x128xf32>
    %7 = arith.addf %3, %6 : vector<256x128xf32>
    %c0_6 = arith.constant 0 : index
    %c0_7 = arith.constant 0 : index
    %8 = vector.load %arg7[%c0_6, %c0_7] : memref<256x128xf32, #tpu.memory_space<vmem>>, vector<256x128xf32>
    tpu.vector_store %arg7[%c0_6, %c0_7], %7 {strides = array<i32>} : memref<256x128xf32, #tpu.memory_space<vmem>>, vector<256x128xf32>,
    %c0_i32_8 = arith.constant 0 : i32
    %9 = arith.cmpi eq, %arg2, %c0_i32_8 : i32
    %10 = arith.extui %9 : i1 to i32
    %c0_i32_9 = arith.constant 0 : i32
    %11 = arith.cmpi ne, %10, %c0_i32_9 : i32
    scf.if %11 {
      %c0_10 = arith.constant 0 : index
      %c0_11 = arith.constant 0 : index
      %12 = vector.load %arg7[%c0_10, %c0_11] : memref<256x128xf32, #tpu.memory_space<vmem>>, vector<256x128xf32>
      %c0_12 = arith.constant 0 : index
      %c0_13 = arith.constant 0 : index
      %13 = vector.load %arg5[%c0_12, %c0_13] : memref<1x128xf32, #tpu.memory_space<vmem>>, vector<1x128xf32>
      %14 = vector.broadcast %13 : vector<1x128xf32> to vector<256x128xf32>
      %15 = arith.addf %12, %14 : vector<256x128xf32>
      %c0_14 = arith.constant 0 : index
      %c0_15 = arith.constant 0 : index
      %16 = vector.load %arg6[%c0_14, %c0_15] : memref<256x128xf32, #tpu.memory_space<vmem>>, vector<256x128xf32>
      tpu.vector_store %arg6[%c0_14, %c0_15], %15 {strides = array<i32>} : memref<256x128xf32, #tpu.memory_space<vmem>>, vector<256x128xf32>,
    } else {
    }
    return
  }
  func.func @transform_0(%arg0: i32, %arg1: i32, %arg2: i32) -> (i32, i32) {
    %c0_i32 = arith.constant 0 : i32
    return %arg0, %arg2 : i32, i32
  }
  func.func @transform_1(%arg0: i32, %arg1: i32, %arg2: i32) -> (i32, i32) {
    %c0_i32 = arith.constant 0 : i32
    return %arg2, %arg1 : i32, i32
  }
  func.func @transform_2(%arg0: i32, %arg1: i32, %arg2: i32) -> (i32, i32) {
    %c0_i32 = arith.constant 0 : i32
    %c0_i32_0 = arith.constant 0 : i32
    return %c0_i32, %arg1 : i32, i32
  }
  func.func @transform_3(%arg0: i32, %arg1: i32, %arg2: i32) -> (i32, i32) {
    %c0_i32 = arith.constant 0 : i32
    return %arg0, %arg1 : i32, i32
  }
}

module attributes {stable_mosaic.version = 11 : i64} {
  func.func @_conv_gemm_kernel(%arg0: i32, %arg1: i32, %arg2: i32, %arg3: memref<256x36xbf16, #tpu.memory_space<vmem>>, %arg4: memref<36x128xbf16, #tpu.memory_space<vmem>>, %arg5: memref<1x128xf32, #tpu.memory_space<vmem>>, %arg6: memref<256x128xf32, #tpu.memory_space<vmem>>, %arg7: memref<256x128xf32, #tpu.memory_space<vmem>>) attributes {dimension_semantics = [#tpu.dimension_semantics<parallel>, #tpu.dimension_semantics<parallel>, #tpu.dimension_semantics<arbitrary>], iteration_bounds = array<i64: 2, 1, 1>, scalar_prefetch = 0 : i64, scratch_operands = 1 : i64, tpu.core_type = #tpu.core_type<tc>, window_params = [{transform_indices = @transform_0, window_bounds = array<i64: 256, 36>}, {transform_indices = @transform_1, window_bounds = array<i64: 36, 128>}, {transform_indices = @transform_2, window_bounds = array<i64: 1, 128>}, {transform_indices = @transform_3, window_bounds = array<i64: 256, 128>}]} {
    %c0_i32 = arith.constant 0 : i32
    %0 = arith.cmpi eq, %arg2, %c0_i32 : i32
    %1 = arith.extui %0 : i1 to i32
    %c0_i32_0 = arith.constant 0 : i32
    %2 = arith.cmpi ne, %1, %c0_i32_0 : i32
    scf.if %2 {
      %cst_10 = arith.constant 0.000000e+00 : f32
      %12 = vector.broadcast %cst_10 : f32 to vector<256x128xf32>
      %c0_11 = arith.constant 0 : index
      %c0_12 = arith.constant 0 : index
      %13 = vector.load %arg7[%c0_11, %c0_12] : memref<256x128xf32, #tpu.memory_space<vmem>>, vector<256x128xf32>
      tpu.vector_store %arg7[%c0_11, %c0_12], %12 {strides = array<i32>} : memref<256x128xf32, #tpu.memory_space<vmem>>, vector<256x128xf32>,
    } else {
    }
    %c0 = arith.constant 0 : index
    %c0_1 = arith.constant 0 : index
    %3 = vector.load %arg7[%c0, %c0_1] : memref<256x128xf32, #tpu.memory_space<vmem>>, vector<256x128xf32>
    %c0_2 = arith.constant 0 : index
    %c0_3 = arith.constant 0 : index
    %4 = vector.load %arg3[%c0_2, %c0_3] : memref<256x36xbf16, #tpu.memory_space<vmem>>, vector<256x36xbf16>
    %c0_4 = arith.constant 0 : index
    %c0_5 = arith.constant 0 : index
    %5 = vector.load %arg4[%c0_4, %c0_5] : memref<36x128xbf16, #tpu.memory_space<vmem>>, vector<36x128xbf16>
    %cst = arith.constant dense<0.000000e+00> : vector<256x128xf32>
    %6 = tpu.matmul %4, %5, %cst {dimension_numbers = #tpu.dot_dimension_numbers<[1], [0], [0], [1], [0, 0, 1, 1], [], []>} : vector<256x36xbf16>, vector<36x128xbf16>, vector<256x128xf32> -> vector<256x128xf32>
    %7 = arith.addf %3, %6 : vector<256x128xf32>
    %c0_6 = arith.constant 0 : index
    %c0_7 = arith.constant 0 : index
    %8 = vector.load %arg7[%c0_6, %c0_7] : memref<256x128xf32, #tpu.memory_space<vmem>>, vector<256x128xf32>
    tpu.vector_store %arg7[%c0_6, %c0_7], %7 {strides = array<i32>} : memref<256x128xf32, #tpu.memory_space<vmem>>, vector<256x128xf32>,
    %c0_i32_8 = arith.constant 0 : i32
    %9 = arith.cmpi eq, %arg2, %c0_i32_8 : i32
    %10 = arith.extui %9 : i1 to i32
    %c0_i32_9 = arith.constant 0 : i32
    %11 = arith.cmpi ne, %10, %c0_i32_9 : i32
    scf.if %11 {
      %c0_10 = arith.constant 0 : index
      %c0_11 = arith.constant 0 : index
      %12 = vector.load %arg7[%c0_10, %c0_11] : memref<256x128xf32, #tpu.memory_space<vmem>>, vector<256x128xf32>
      %c0_12 = arith.constant 0 : index
      %c0_13 = arith.constant 0 : index
      %13 = vector.load %arg5[%c0_12, %c0_13] : memref<1x128xf32, #tpu.memory_space<vmem>>, vector<1x128xf32>
      %14 = vector.broadcast %13 : vector<1x128xf32> to vector<256x128xf32>
      %15 = arith.addf %12, %14 : vector<256x128xf32>
      %c0_14 = arith.constant 0 : index
      %c0_15 = arith.constant 0 : index
      %16 = vector.load %arg6[%c0_14, %c0_15] : memref<256x128xf32, #tpu.memory_space<vmem>>, vector<256x128xf32>
      tpu.vector_store %arg6[%c0_14, %c0_15], %15 {strides = array<i32>} : memref<256x128xf32, #tpu.memory_space<vmem>>, vector<256x128xf32>,
    } else {
    }
    return
  }
  func.func @transform_0(%arg0: i32, %arg1: i32, %arg2: i32) -> (i32, i32) {
    %c0_i32 = arith.constant 0 : i32
    return %arg0, %arg2 : i32, i32
  }
  func.func @transform_1(%arg0: i32, %arg1: i32, %arg2: i32) -> (i32, i32) {
    %c0_i32 = arith.constant 0 : i32
    return %arg2, %arg1 : i32, i32
  }
  func.func @transform_2(%arg0: i32, %arg1: i32, %arg2: i32) -> (i32, i32) {
    %c0_i32 = arith.constant 0 : i32
    %c0_i32_0 = arith.constant 0 : i32
    return %c0_i32, %arg1 : i32, i32
  }
  func.func @transform_3(%arg0: i32, %arg1: i32, %arg2: i32) -> (i32, i32) {
    %c0_i32 = arith.constant 0 : i32
    return %arg0, %arg1 : i32, i32
  }
}

module attributes {stable_mosaic.version = 11 : i64} {
  func.func @_conv_gemm_kernel(%arg0: i32, %arg1: i32, %arg2: i32, %arg3: memref<96x72xbf16, #tpu.memory_space<vmem>>, %arg4: memref<72x128xbf16, #tpu.memory_space<vmem>>, %arg5: memref<1x128xf32, #tpu.memory_space<vmem>>, %arg6: memref<96x128xf32, #tpu.memory_space<vmem>>, %arg7: memref<96x128xf32, #tpu.memory_space<vmem>>) attributes {dimension_semantics = [#tpu.dimension_semantics<parallel>, #tpu.dimension_semantics<parallel>, #tpu.dimension_semantics<arbitrary>], iteration_bounds = array<i64: 1, 1, 1>, scalar_prefetch = 0 : i64, scratch_operands = 1 : i64, tpu.core_type = #tpu.core_type<tc>, window_params = [{transform_indices = @transform_0, window_bounds = array<i64: 96, 72>}, {transform_indices = @transform_1, window_bounds = array<i64: 72, 128>}, {transform_indices = @transform_2, window_bounds = array<i64: 1, 128>}, {transform_indices = @transform_3, window_bounds = array<i64: 96, 128>}]} {
    %c0_i32 = arith.constant 0 : i32
    %0 = arith.cmpi eq, %arg2, %c0_i32 : i32
    %1 = arith.extui %0 : i1 to i32
    %c0_i32_0 = arith.constant 0 : i32
    %2 = arith.cmpi ne, %1, %c0_i32_0 : i32
    scf.if %2 {
      %cst_10 = arith.constant 0.000000e+00 : f32
      %12 = vector.broadcast %cst_10 : f32 to vector<96x128xf32>
      %c0_11 = arith.constant 0 : index
      %c0_12 = arith.constant 0 : index
      %13 = vector.load %arg7[%c0_11, %c0_12] : memref<96x128xf32, #tpu.memory_space<vmem>>, vector<96x128xf32>
      tpu.vector_store %arg7[%c0_11, %c0_12], %12 {strides = array<i32>} : memref<96x128xf32, #tpu.memory_space<vmem>>, vector<96x128xf32>,
    } else {
    }
    %c0 = arith.constant 0 : index
    %c0_1 = arith.constant 0 : index
    %3 = vector.load %arg7[%c0, %c0_1] : memref<96x128xf32, #tpu.memory_space<vmem>>, vector<96x128xf32>
    %c0_2 = arith.constant 0 : index
    %c0_3 = arith.constant 0 : index
    %4 = vector.load %arg3[%c0_2, %c0_3] : memref<96x72xbf16, #tpu.memory_space<vmem>>, vector<96x72xbf16>
    %c0_4 = arith.constant 0 : index
    %c0_5 = arith.constant 0 : index
    %5 = vector.load %arg4[%c0_4, %c0_5] : memref<72x128xbf16, #tpu.memory_space<vmem>>, vector<72x128xbf16>
    %cst = arith.constant dense<0.000000e+00> : vector<96x128xf32>
    %6 = tpu.matmul %4, %5, %cst {dimension_numbers = #tpu.dot_dimension_numbers<[1], [0], [0], [1], [0, 0, 1, 1], [], []>} : vector<96x72xbf16>, vector<72x128xbf16>, vector<96x128xf32> -> vector<96x128xf32>
    %7 = arith.addf %3, %6 : vector<96x128xf32>
    %c0_6 = arith.constant 0 : index
    %c0_7 = arith.constant 0 : index
    %8 = vector.load %arg7[%c0_6, %c0_7] : memref<96x128xf32, #tpu.memory_space<vmem>>, vector<96x128xf32>
    tpu.vector_store %arg7[%c0_6, %c0_7], %7 {strides = array<i32>} : memref<96x128xf32, #tpu.memory_space<vmem>>, vector<96x128xf32>,
    %c0_i32_8 = arith.constant 0 : i32
    %9 = arith.cmpi eq, %arg2, %c0_i32_8 : i32
    %10 = arith.extui %9 : i1 to i32
    %c0_i32_9 = arith.constant 0 : i32
    %11 = arith.cmpi ne, %10, %c0_i32_9 : i32
    scf.if %11 {
      %c0_10 = arith.constant 0 : index
      %c0_11 = arith.constant 0 : index
      %12 = vector.load %arg7[%c0_10, %c0_11] : memref<96x128xf32, #tpu.memory_space<vmem>>, vector<96x128xf32>
      %c0_12 = arith.constant 0 : index
      %c0_13 = arith.constant 0 : index
      %13 = vector.load %arg5[%c0_12, %c0_13] : memref<1x128xf32, #tpu.memory_space<vmem>>, vector<1x128xf32>
      %14 = vector.broadcast %13 : vector<1x128xf32> to vector<96x128xf32>
      %15 = arith.addf %12, %14 : vector<96x128xf32>
      %c0_14 = arith.constant 0 : index
      %c0_15 = arith.constant 0 : index
      %16 = vector.load %arg6[%c0_14, %c0_15] : memref<96x128xf32, #tpu.memory_space<vmem>>, vector<96x128xf32>
      tpu.vector_store %arg6[%c0_14, %c0_15], %15 {strides = array<i32>} : memref<96x128xf32, #tpu.memory_space<vmem>>, vector<96x128xf32>,
    } else {
    }
    return
  }
  func.func @transform_0(%arg0: i32, %arg1: i32, %arg2: i32) -> (i32, i32) {
    %c0_i32 = arith.constant 0 : i32
    return %arg0, %arg2 : i32, i32
  }
  func.func @transform_1(%arg0: i32, %arg1: i32, %arg2: i32) -> (i32, i32) {
    %c0_i32 = arith.constant 0 : i32
    return %arg2, %arg1 : i32, i32
  }
  func.func @transform_2(%arg0: i32, %arg1: i32, %arg2: i32) -> (i32, i32) {
    %c0_i32 = arith.constant 0 : i32
    %c0_i32_0 = arith.constant 0 : i32
    return %c0_i32, %arg1 : i32, i32
  }
  func.func @transform_3(%arg0: i32, %arg1: i32, %arg2: i32) -> (i32, i32) {
    %c0_i32 = arith.constant 0 : i32
    return %arg0, %arg1 : i32, i32
  }
}

module attributes {stable_mosaic.version = 11 : i64} {
  func.func @_conv_gemm_kernel(%arg0: i32, %arg1: i32, %arg2: i32, %arg3: memref<96x144xbf16, #tpu.memory_space<vmem>>, %arg4: memref<144x128xbf16, #tpu.memory_space<vmem>>, %arg5: memref<1x128xf32, #tpu.memory_space<vmem>>, %arg6: memref<96x128xf32, #tpu.memory_space<vmem>>, %arg7: memref<96x128xf32, #tpu.memory_space<vmem>>) attributes {dimension_semantics = [#tpu.dimension_semantics<parallel>, #tpu.dimension_semantics<parallel>, #tpu.dimension_semantics<arbitrary>], iteration_bounds = array<i64: 1, 1, 1>, scalar_prefetch = 0 : i64, scratch_operands = 1 : i64, tpu.core_type = #tpu.core_type<tc>, window_params = [{transform_indices = @transform_0, window_bounds = array<i64: 96, 144>}, {transform_indices = @transform_1, window_bounds = array<i64: 144, 128>}, {transform_indices = @transform_2, window_bounds = array<i64: 1, 128>}, {transform_indices = @transform_3, window_bounds = array<i64: 96, 128>}]} {
    %c0_i32 = arith.constant 0 : i32
    %0 = arith.cmpi eq, %arg2, %c0_i32 : i32
    %1 = arith.extui %0 : i1 to i32
    %c0_i32_0 = arith.constant 0 : i32
    %2 = arith.cmpi ne, %1, %c0_i32_0 : i32
    scf.if %2 {
      %cst_10 = arith.constant 0.000000e+00 : f32
      %12 = vector.broadcast %cst_10 : f32 to vector<96x128xf32>
      %c0_11 = arith.constant 0 : index
      %c0_12 = arith.constant 0 : index
      %13 = vector.load %arg7[%c0_11, %c0_12] : memref<96x128xf32, #tpu.memory_space<vmem>>, vector<96x128xf32>
      tpu.vector_store %arg7[%c0_11, %c0_12], %12 {strides = array<i32>} : memref<96x128xf32, #tpu.memory_space<vmem>>, vector<96x128xf32>,
    } else {
    }
    %c0 = arith.constant 0 : index
    %c0_1 = arith.constant 0 : index
    %3 = vector.load %arg7[%c0, %c0_1] : memref<96x128xf32, #tpu.memory_space<vmem>>, vector<96x128xf32>
    %c0_2 = arith.constant 0 : index
    %c0_3 = arith.constant 0 : index
    %4 = vector.load %arg3[%c0_2, %c0_3] : memref<96x144xbf16, #tpu.memory_space<vmem>>, vector<96x144xbf16>
    %c0_4 = arith.constant 0 : index
    %c0_5 = arith.constant 0 : index
    %5 = vector.load %arg4[%c0_4, %c0_5] : memref<144x128xbf16, #tpu.memory_space<vmem>>, vector<144x128xbf16>
    %cst = arith.constant dense<0.000000e+00> : vector<96x128xf32>
    %6 = tpu.matmul %4, %5, %cst {dimension_numbers = #tpu.dot_dimension_numbers<[1], [0], [0], [1], [0, 0, 1, 1], [], []>} : vector<96x144xbf16>, vector<144x128xbf16>, vector<96x128xf32> -> vector<96x128xf32>
    %7 = arith.addf %3, %6 : vector<96x128xf32>
    %c0_6 = arith.constant 0 : index
    %c0_7 = arith.constant 0 : index
    %8 = vector.load %arg7[%c0_6, %c0_7] : memref<96x128xf32, #tpu.memory_space<vmem>>, vector<96x128xf32>
    tpu.vector_store %arg7[%c0_6, %c0_7], %7 {strides = array<i32>} : memref<96x128xf32, #tpu.memory_space<vmem>>, vector<96x128xf32>,
    %c0_i32_8 = arith.constant 0 : i32
    %9 = arith.cmpi eq, %arg2, %c0_i32_8 : i32
    %10 = arith.extui %9 : i1 to i32
    %c0_i32_9 = arith.constant 0 : i32
    %11 = arith.cmpi ne, %10, %c0_i32_9 : i32
    scf.if %11 {
      %c0_10 = arith.constant 0 : index
      %c0_11 = arith.constant 0 : index
      %12 = vector.load %arg7[%c0_10, %c0_11] : memref<96x128xf32, #tpu.memory_space<vmem>>, vector<96x128xf32>
      %c0_12 = arith.constant 0 : index
      %c0_13 = arith.constant 0 : index
      %13 = vector.load %arg5[%c0_12, %c0_13] : memref<1x128xf32, #tpu.memory_space<vmem>>, vector<1x128xf32>
      %14 = vector.broadcast %13 : vector<1x128xf32> to vector<96x128xf32>
      %15 = arith.addf %12, %14 : vector<96x128xf32>
      %c0_14 = arith.constant 0 : index
      %c0_15 = arith.constant 0 : index
      %16 = vector.load %arg6[%c0_14, %c0_15] : memref<96x128xf32, #tpu.memory_space<vmem>>, vector<96x128xf32>
      tpu.vector_store %arg6[%c0_14, %c0_15], %15 {strides = array<i32>} : memref<96x128xf32, #tpu.memory_space<vmem>>, vector<96x128xf32>,
    } else {
    }
    return
  }
  func.func @transform_0(%arg0: i32, %arg1: i32, %arg2: i32) -> (i32, i32) {
    %c0_i32 = arith.constant 0 : i32
    return %arg0, %arg2 : i32, i32
  }
  func.func @transform_1(%arg0: i32, %arg1: i32, %arg2: i32) -> (i32, i32) {
    %c0_i32 = arith.constant 0 : i32
    return %arg2, %arg1 : i32, i32
  }
  func.func @transform_2(%arg0: i32, %arg1: i32, %arg2: i32) -> (i32, i32) {
    %c0_i32 = arith.constant 0 : i32
    %c0_i32_0 = arith.constant 0 : i32
    return %c0_i32, %arg1 : i32, i32
  }
  func.func @transform_3(%arg0: i32, %arg1: i32, %arg2: i32) -> (i32, i32) {
    %c0_i32 = arith.constant 0 : i32
    return %arg0, %arg1 : i32, i32
  }
}

module attributes {stable_mosaic.version = 11 : i64} {
  func.func @_conv_gemm_kernel(%arg0: i32, %arg1: i32, %arg2: i32, %arg3: memref<32x288xbf16, #tpu.memory_space<vmem>>, %arg4: memref<288x128xbf16, #tpu.memory_space<vmem>>, %arg5: memref<1x128xf32, #tpu.memory_space<vmem>>, %arg6: memref<32x128xf32, #tpu.memory_space<vmem>>, %arg7: memref<32x128xf32, #tpu.memory_space<vmem>>) attributes {dimension_semantics = [#tpu.dimension_semantics<parallel>, #tpu.dimension_semantics<parallel>, #tpu.dimension_semantics<arbitrary>], iteration_bounds = array<i64: 1, 1, 1>, scalar_prefetch = 0 : i64, scratch_operands = 1 : i64, tpu.core_type = #tpu.core_type<tc>, window_params = [{transform_indices = @transform_0, window_bounds = array<i64: 32, 288>}, {transform_indices = @transform_1, window_bounds = array<i64: 288, 128>}, {transform_indices = @transform_2, window_bounds = array<i64: 1, 128>}, {transform_indices = @transform_3, window_bounds = array<i64: 32, 128>}]} {
    %c0_i32 = arith.constant 0 : i32
    %0 = arith.cmpi eq, %arg2, %c0_i32 : i32
    %1 = arith.extui %0 : i1 to i32
    %c0_i32_0 = arith.constant 0 : i32
    %2 = arith.cmpi ne, %1, %c0_i32_0 : i32
    scf.if %2 {
      %cst_10 = arith.constant 0.000000e+00 : f32
      %12 = vector.broadcast %cst_10 : f32 to vector<32x128xf32>
      %c0_11 = arith.constant 0 : index
      %c0_12 = arith.constant 0 : index
      %13 = vector.load %arg7[%c0_11, %c0_12] : memref<32x128xf32, #tpu.memory_space<vmem>>, vector<32x128xf32>
      tpu.vector_store %arg7[%c0_11, %c0_12], %12 {strides = array<i32>} : memref<32x128xf32, #tpu.memory_space<vmem>>, vector<32x128xf32>,
    } else {
    }
    %c0 = arith.constant 0 : index
    %c0_1 = arith.constant 0 : index
    %3 = vector.load %arg7[%c0, %c0_1] : memref<32x128xf32, #tpu.memory_space<vmem>>, vector<32x128xf32>
    %c0_2 = arith.constant 0 : index
    %c0_3 = arith.constant 0 : index
    %4 = vector.load %arg3[%c0_2, %c0_3] : memref<32x288xbf16, #tpu.memory_space<vmem>>, vector<32x288xbf16>
    %c0_4 = arith.constant 0 : index
    %c0_5 = arith.constant 0 : index
    %5 = vector.load %arg4[%c0_4, %c0_5] : memref<288x128xbf16, #tpu.memory_space<vmem>>, vector<288x128xbf16>
    %cst = arith.constant dense<0.000000e+00> : vector<32x128xf32>
    %6 = tpu.matmul %4, %5, %cst {dimension_numbers = #tpu.dot_dimension_numbers<[1], [0], [0], [1], [0, 0, 1, 1], [], []>} : vector<32x288xbf16>, vector<288x128xbf16>, vector<32x128xf32> -> vector<32x128xf32>
    %7 = arith.addf %3, %6 : vector<32x128xf32>
    %c0_6 = arith.constant 0 : index
    %c0_7 = arith.constant 0 : index
    %8 = vector.load %arg7[%c0_6, %c0_7] : memref<32x128xf32, #tpu.memory_space<vmem>>, vector<32x128xf32>
    tpu.vector_store %arg7[%c0_6, %c0_7], %7 {strides = array<i32>} : memref<32x128xf32, #tpu.memory_space<vmem>>, vector<32x128xf32>,
    %c0_i32_8 = arith.constant 0 : i32
    %9 = arith.cmpi eq, %arg2, %c0_i32_8 : i32
    %10 = arith.extui %9 : i1 to i32
    %c0_i32_9 = arith.constant 0 : i32
    %11 = arith.cmpi ne, %10, %c0_i32_9 : i32
    scf.if %11 {
      %c0_10 = arith.constant 0 : index
      %c0_11 = arith.constant 0 : index
      %12 = vector.load %arg7[%c0_10, %c0_11] : memref<32x128xf32, #tpu.memory_space<vmem>>, vector<32x128xf32>
      %c0_12 = arith.constant 0 : index
      %c0_13 = arith.constant 0 : index
      %13 = vector.load %arg5[%c0_12, %c0_13] : memref<1x128xf32, #tpu.memory_space<vmem>>, vector<1x128xf32>
      %14 = vector.broadcast %13 : vector<1x128xf32> to vector<32x128xf32>
      %15 = arith.addf %12, %14 : vector<32x128xf32>
      %c0_14 = arith.constant 0 : index
      %c0_15 = arith.constant 0 : index
      %16 = vector.load %arg6[%c0_14, %c0_15] : memref<32x128xf32, #tpu.memory_space<vmem>>, vector<32x128xf32>
      tpu.vector_store %arg6[%c0_14, %c0_15], %15 {strides = array<i32>} : memref<32x128xf32, #tpu.memory_space<vmem>>, vector<32x128xf32>,
    } else {
    }
    return
  }
  func.func @transform_0(%arg0: i32, %arg1: i32, %arg2: i32) -> (i32, i32) {
    %c0_i32 = arith.constant 0 : i32
    return %arg0, %arg2 : i32, i32
  }
  func.func @transform_1(%arg0: i32, %arg1: i32, %arg2: i32) -> (i32, i32) {
    %c0_i32 = arith.constant 0 : i32
    return %arg2, %arg1 : i32, i32
  }
  func.func @transform_2(%arg0: i32, %arg1: i32, %arg2: i32) -> (i32, i32) {
    %c0_i32 = arith.constant 0 : i32
    %c0_i32_0 = arith.constant 0 : i32
    return %c0_i32, %arg1 : i32, i32
  }
  func.func @transform_3(%arg0: i32, %arg1: i32, %arg2: i32) -> (i32, i32) {
    %c0_i32 = arith.constant 0 : i32
    return %arg0, %arg1 : i32, i32
  }
}

module attributes {stable_mosaic.version = 11 : i64} {
  func.func @_conv_gemm_kernel(%arg0: i32, %arg1: i32, %arg2: i32, %arg3: memref<32x576xbf16, #tpu.memory_space<vmem>>, %arg4: memref<576x128xbf16, #tpu.memory_space<vmem>>, %arg5: memref<1x128xf32, #tpu.memory_space<vmem>>, %arg6: memref<32x128xf32, #tpu.memory_space<vmem>>, %arg7: memref<32x128xf32, #tpu.memory_space<vmem>>) attributes {dimension_semantics = [#tpu.dimension_semantics<parallel>, #tpu.dimension_semantics<parallel>, #tpu.dimension_semantics<arbitrary>], iteration_bounds = array<i64: 1, 1, 1>, scalar_prefetch = 0 : i64, scratch_operands = 1 : i64, tpu.core_type = #tpu.core_type<tc>, window_params = [{transform_indices = @transform_0, window_bounds = array<i64: 32, 576>}, {transform_indices = @transform_1, window_bounds = array<i64: 576, 128>}, {transform_indices = @transform_2, window_bounds = array<i64: 1, 128>}, {transform_indices = @transform_3, window_bounds = array<i64: 32, 128>}]} {
    %c0_i32 = arith.constant 0 : i32
    %0 = arith.cmpi eq, %arg2, %c0_i32 : i32
    %1 = arith.extui %0 : i1 to i32
    %c0_i32_0 = arith.constant 0 : i32
    %2 = arith.cmpi ne, %1, %c0_i32_0 : i32
    scf.if %2 {
      %cst_10 = arith.constant 0.000000e+00 : f32
      %12 = vector.broadcast %cst_10 : f32 to vector<32x128xf32>
      %c0_11 = arith.constant 0 : index
      %c0_12 = arith.constant 0 : index
      %13 = vector.load %arg7[%c0_11, %c0_12] : memref<32x128xf32, #tpu.memory_space<vmem>>, vector<32x128xf32>
      tpu.vector_store %arg7[%c0_11, %c0_12], %12 {strides = array<i32>} : memref<32x128xf32, #tpu.memory_space<vmem>>, vector<32x128xf32>,
    } else {
    }
    %c0 = arith.constant 0 : index
    %c0_1 = arith.constant 0 : index
    %3 = vector.load %arg7[%c0, %c0_1] : memref<32x128xf32, #tpu.memory_space<vmem>>, vector<32x128xf32>
    %c0_2 = arith.constant 0 : index
    %c0_3 = arith.constant 0 : index
    %4 = vector.load %arg3[%c0_2, %c0_3] : memref<32x576xbf16, #tpu.memory_space<vmem>>, vector<32x576xbf16>
    %c0_4 = arith.constant 0 : index
    %c0_5 = arith.constant 0 : index
    %5 = vector.load %arg4[%c0_4, %c0_5] : memref<576x128xbf16, #tpu.memory_space<vmem>>, vector<576x128xbf16>
    %cst = arith.constant dense<0.000000e+00> : vector<32x128xf32>
    %6 = tpu.matmul %4, %5, %cst {dimension_numbers = #tpu.dot_dimension_numbers<[1], [0], [0], [1], [0, 0, 1, 1], [], []>} : vector<32x576xbf16>, vector<576x128xbf16>, vector<32x128xf32> -> vector<32x128xf32>
    %7 = arith.addf %3, %6 : vector<32x128xf32>
    %c0_6 = arith.constant 0 : index
    %c0_7 = arith.constant 0 : index
    %8 = vector.load %arg7[%c0_6, %c0_7] : memref<32x128xf32, #tpu.memory_space<vmem>>, vector<32x128xf32>
    tpu.vector_store %arg7[%c0_6, %c0_7], %7 {strides = array<i32>} : memref<32x128xf32, #tpu.memory_space<vmem>>, vector<32x128xf32>,
    %c0_i32_8 = arith.constant 0 : i32
    %9 = arith.cmpi eq, %arg2, %c0_i32_8 : i32
    %10 = arith.extui %9 : i1 to i32
    %c0_i32_9 = arith.constant 0 : i32
    %11 = arith.cmpi ne, %10, %c0_i32_9 : i32
    scf.if %11 {
      %c0_10 = arith.constant 0 : index
      %c0_11 = arith.constant 0 : index
      %12 = vector.load %arg7[%c0_10, %c0_11] : memref<32x128xf32, #tpu.memory_space<vmem>>, vector<32x128xf32>
      %c0_12 = arith.constant 0 : index
      %c0_13 = arith.constant 0 : index
      %13 = vector.load %arg5[%c0_12, %c0_13] : memref<1x128xf32, #tpu.memory_space<vmem>>, vector<1x128xf32>
      %14 = vector.broadcast %13 : vector<1x128xf32> to vector<32x128xf32>
      %15 = arith.addf %12, %14 : vector<32x128xf32>
      %c0_14 = arith.constant 0 : index
      %c0_15 = arith.constant 0 : index
      %16 = vector.load %arg6[%c0_14, %c0_15] : memref<32x128xf32, #tpu.memory_space<vmem>>, vector<32x128xf32>
      tpu.vector_store %arg6[%c0_14, %c0_15], %15 {strides = array<i32>} : memref<32x128xf32, #tpu.memory_space<vmem>>, vector<32x128xf32>,
    } else {
    }
    return
  }
  func.func @transform_0(%arg0: i32, %arg1: i32, %arg2: i32) -> (i32, i32) {
    %c0_i32 = arith.constant 0 : i32
    return %arg0, %arg2 : i32, i32
  }
  func.func @transform_1(%arg0: i32, %arg1: i32, %arg2: i32) -> (i32, i32) {
    %c0_i32 = arith.constant 0 : i32
    return %arg2, %arg1 : i32, i32
  }
  func.func @transform_2(%arg0: i32, %arg1: i32, %arg2: i32) -> (i32, i32) {
    %c0_i32 = arith.constant 0 : i32
    %c0_i32_0 = arith.constant 0 : i32
    return %c0_i32, %arg1 : i32, i32
  }
  func.func @transform_3(%arg0: i32, %arg1: i32, %arg2: i32) -> (i32, i32) {
    %c0_i32 = arith.constant 0 : i32
    return %arg0, %arg1 : i32, i32
  }
}

</mosaic_0001>

<bundles_post_ra>
// kernel: _resolution_forward.8
= control target key start
LH: loop header
LB: loop body
LE: loop exit
PB: predicated region body
PF: predicated region fallthrough
CT: control target
= control target key end

     0   :  { %vm81_vm0 = vcmask 130048   ;;  %s1164_s1 = inlined_call_operand.vmem [shape: bf16[16,128], index: 1, kind: input, shape index: {}]   ;;  %s1165_s2 = inlined_call_operand.vmem [shape: bf16[16,128], index: 2, kind: input, shape index: {}]   ;;  %s1166_s0 = inlined_call_operand.vmem [shape: bf16[128,16], index: 0, kind: input, shape index: {}]   ;;  %s1167_s3 = inlined_call_operand.vmem [shape: f32[128,128], index: 3, kind: output, shape index: {0}]   ;;  %s1168_s4 = inlined_call_operand.vmem [shape: f32[128,128], index: 4, kind: output, shape index: {1}]  }
   0x1   :  { %v684_v0 = vld [vmem:[%s1164_s1] sm:$0xff]   ;;  %v687_v3 = vld [vmem:[%s1166_s0 + $0x8] sm:$0xff]   ;;  %v688_v4 = vld [vmem:[%s1166_s0 + $0x10] sm:$0xff]  }
   0x2   :  { %v685_v1 = vld [vmem:[%s1165_s2] sm:$0xff]   ;;  %648 = vmatprep.subr.bf16.mxu0 %v684_v0  ;;  %v689_v5 = vld [vmem:[%s1166_s0 + $0x18] sm:$0xff]   ;;  %v691_v7 = vld [vmem:[%s1166_s0 + $0x28] sm:$0xff]  }
   0x3   :  { %v686_v2 = vld [vmem:[%s1166_s0] sm:$0xff]   ;;  %666 = vmatprep.subr.bf16.mxu1 %v685_v1  ;;  %649 = vmatpush3.bf16.msra.mxu0 %v684_v0  ;;  %v692_v8 = vld [vmem:[%s1166_s0 + $0x30] sm:$0xff]   ;;  %v693_v9 = vld [vmem:[%s1166_s0 + $0x38] sm:$0xff]  }
   0x4   :  { %667 = vmatpush3.bf16.msra.mxu1 %v685_v1  ;;  %650 = vmatprep.mubr.msk.bf16.mxu0 %vm81_vm0, %v686_v2  ;;  %v690_v6 = vld [vmem:[%s1166_s0 + $0x20] sm:$0xff]  }
   0x5   :  { %668 = vmatprep.mubr.msk.bf16.mxu1 %vm81_vm0, %v686_v2 }
   0x6   :  { %651 = vmatmul.mubr.msk.bf16.vlgmr.msra.gmra.mrb[0].mxu0 %vm81_vm0, %v687_v3 }
   0x7   :  { %669 = vmatmul.mubr.msk.bf16.vlgmr.msra.gmra.mrb[0].mxu1 %vm81_vm0, %v687_v3  ;;  %654 = vmatprep.mubr.msk.bf16.mxu0 %vm81_vm0, %v688_v4 }
   0x8   :  { %672 = vmatprep.mubr.msk.bf16.mxu1 %vm81_vm0, %v688_v4 }
   0xe   :  { %655 = vmatmul.mubr.msk.bf16.gmra.mrb[4].mxu0 %vm81_vm0, %v689_v5 }
   0xf   :  { %673 = vmatmul.mubr.msk.bf16.gmra.mrb[4].mxu1 %vm81_vm0, %v689_v5  ;;  %658 = vmatprep.mubr.msk.bf16.mxu0 %vm81_vm0, %v690_v6 }
  0x10   :  { %676 = vmatprep.mubr.msk.bf16.mxu1 %vm81_vm0, %v690_v6 }
  0x16   :  { %659 = vmatmul.mubr.msk.bf16.gmra.mrb[8].mxu0 %vm81_vm0, %v691_v7 }
  0x17   :  { %677 = vmatmul.mubr.msk.bf16.gmra.mrb[8].mxu1 %vm81_vm0, %v691_v7  ;;  %662 = vmatprep.mubr.msk.bf16.mxu0 %vm81_vm0, %v692_v8 }
  0x18   :  { %680 = vmatprep.mubr.msk.bf16.mxu1 %vm81_vm0, %v692_v8 }
  0x1e   :  { %663 = vmatmul.mubr.msk.bf16.gmra.mrb[12].mxu0 %vm81_vm0, %v693_v9 }
  0x1f   :  { %681 = vmatmul.mubr.msk.bf16.gmra.mrb[12].mxu1 %vm81_vm0, %v693_v9 }
  0xd9   :  { %v652_v10 = vpop.f32.mrb[0].mxu0 }
  0xda   :  { %v310_v11 = vmul.f32 %v652_v10, %v652_v10  ;;  %v670_v12 = vpop.f32.mrb[0].mxu1  ;;  %v140_v13 = vpop.f32.mrb[1].mxu0 }
  0xdb   :  { %v326_v14 = vmul.f32 %v670_v12, %v670_v12  ;;  %v308_v15 = vmul.f32 %v140_v13, %v140_v13  ;;  %v245_v16 = vpop.f32.mrb[1].mxu1  ;;  %v653_v17 = vpop.f32.mrb[2].mxu0 }
  0xdc   :  { %v324_v18 = vmul.f32 %v245_v16, %v245_v16  ;;  %v311_v19 = vmul.f32 %v653_v17, %v653_v17  ;;  %v671_v20 = vpop.f32.mrb[2].mxu1  ;;  %v143_v21 = vpop.f32.mrb[3].mxu0 }
  0xdd   :  { %v342_v22 = vadd.f32 %v326_v14, %v310_v11  ;;  %v327_v23 = vmul.f32 %v671_v20, %v671_v20  ;;  %v309_v24 = vmul.f32 %v143_v21, %v143_v21  ;;  %v248_v25 = vpop.f32.mrb[3].mxu1 }
  0xde   :  { %v340_v26 = vadd.f32 %v324_v18, %v308_v15  ;;  %v325_v27 = vmul.f32 %v248_v25, %v248_v25 }
  0xdf   :  { %v829_v28 = vadd.f32 1e-09, %v342_v22  ;;  %v343_v29 = vadd.f32 %v327_v23, %v311_v19 }
  0xe0   :  { %v831_v30 = vadd.f32 1e-09, %v340_v26  ;;  %v341_v31 = vadd.f32 %v325_v27, %v309_v24 }
  0xe1   :  { %694 = vrsqrt.f32 %v829_v28  ;;  %v656_v32 = vpop.f32.mrb[4].mxu0  ;;  %v836_v35 = vadd.f32 1e-09, %v343_v29  ;;  %vm388_vm1 = vcmp.eq.f32.partialorder %v829_v28, inf  ;;  %vm390_vm2 = vcmp.eq.f32.partialorder %v829_v28, 0.0 }
  0xe2   :  { %696 = vlog2.f32 %v829_v28  ;;  %v674_v33 = vpop.f32.mrb[4].mxu1  ;;  %v156_v34 = vpop.f32.mrb[5].mxu0  ;;  %v838_v36 = vadd.f32 1e-09, %v341_v31  ;;  %v314_v37 = vmul.f32 %v656_v32, %v656_v32  ;;  %v391_v46 = vand.u32 2147483648, %v829_v28 }
  0xe3   :  { %698 = vrsqrt.f32 %v831_v30  ;;  %v261_v38 = vpop.f32.mrb[5].mxu1  ;;  %v657_v39 = vpop.f32.mrb[6].mxu0  ;;  %v330_v40 = vmul.f32 %v674_v33, %v674_v33  ;;  %v312_v41 = vmul.f32 %v156_v34, %v156_v34  ;;  %vm374_vm3 = vcmp.eq.f32.partialorder %v831_v30, inf }
  0xe4   :  { %700 = vlog2.f32 %v831_v30  ;;  %v328_v42 = vmul.f32 %v261_v38, %v261_v38  ;;  %v675_v43 = vpop.f32.mrb[6].mxu1  ;;  %v159_v44 = vpop.f32.mrb[7].mxu0  ;;  %v315_v49 = vmul.f32 %v657_v39, %v657_v39  ;;  %vm376_vm4 = vcmp.eq.f32.partialorder %v831_v30, 0.0 }
  0xe5   :  { %702 = vrsqrt.f32 %v836_v35  ;;  %v264_v45 = vpop.f32.mrb[7].mxu1  ;;  %v346_v47 = vadd.f32 %v330_v40, %v314_v37  ;;  %v331_v50 = vmul.f32 %v675_v43, %v675_v43  ;;  %v313_v51 = vmul.f32 %v159_v44, %v159_v44 }
  0xe6   :  { %704 = vlog2.f32 %v836_v35  ;;  %v344_v48 = vadd.f32 %v328_v42, %v312_v41  ;;  %v329_v52 = vmul.f32 %v264_v45, %v264_v45  ;;  %v377_v56 = vand.u32 2147483648, %v831_v30 }
  0xe7   :  { %706 = vrsqrt.f32 %v838_v36  ;;  %v850_v53 = vadd.f32 1e-09, %v346_v47  ;;  %vm395_vm5 = vcmp.eq.f32.partialorder %v836_v35, inf  ;;  %v347_v57 = vadd.f32 %v331_v50, %v315_v49 }
  0xe8   :  { %708 = vlog2.f32 %v838_v36  ;;  %v852_v54 = vadd.f32 1e-09, %v344_v48  ;;  %v345_v58 = vadd.f32 %v329_v52, %v313_v51  ;;  %vm397_vm6 = vcmp.eq.f32.partialorder %v836_v35, 0.0 }
  0xe9   :  { %v660_v55 = vpop.f32.mrb[8].mxu0  ;;  %v398_v62 = vand.u32 2147483648, %v836_v35  ;;  %vm381_vm7 = vcmp.eq.f32.partialorder %v838_v36, inf  ;;  %710 = vrsqrt.f32 %v850_v53  ;;  %vm383_vm8 = vcmp.eq.f32.partialorder %v838_v36, 0.0 }
  0xea   :  { %v856_v59 = vpop.f32.mrb[8].mxu1  ;;  %v858_v60 = vpop.f32.mrb[9].mxu0  ;;  %v384_v3 = vand.u32 2147483648, %v838_v36  ;;  %712 = vlog2.f32 %v850_v53  ;;  %v877_v8 = vadd.f32 1e-09, %v347_v57  ;;  %v879_v9 = vmul.f32 %v660_v55, %v660_v55 }
  0xeb   :  { %v695_v61 = vpop.eup %694  ;;  %v864_v63 = vpop.f32.mrb[9].mxu1  ;;  %714 = vrsqrt.f32 %v852_v54  ;;  %v419_v14 = vand.u32 2147483648, %v850_v53  ;;  %vm416_vm9 = vcmp.eq.f32.partialorder %v850_v53, inf  ;;  %vm418_vm10 = vcmp.eq.f32.partialorder %v850_v53, 0.0 }
  0xec   :  { %v866_v0 = vpop.f32.mrb[10].mxu0  ;;  %v697_v1 = vpop.eup %696  ;;  %v387_v2 = vmul.f32 %v695_v61, %v829_v28  ;;  %716 = vlog2.f32 %v852_v54  ;;  %v898_v23 = vadd.f32 1e-09, %v345_v58  ;;  %vm402_vm11 = vcmp.eq.f32.partialorder %v852_v54, inf }
  0xed   :  { %v872_v4 = vpop.f32.mrb[10].mxu1  ;;  %v874_v5 = vpop.f32.mrb[11].mxu0  ;;  %v521_v7 = vmul.f32 0.6931472, %v697_v1  ;;  %718 = vrsqrt.f32 %v877_v8  ;;  %vm404_vm12 = vcmp.eq.f32.partialorder %v852_v54, 0.0  ;;  %v405_v45 = vand.u32 2147483648, %v852_v54 }
  0xee   :  { %v699_v6 = vpop.eup %698  ;;  %v881_v10 = vpop.f32.mrb[11].mxu1  ;;  %v389_v12 = vsel %vm388_vm1, %v829_v28, %v387_v2  ;;  %720 = vlog2.f32 %v877_v8  ;;  %vm423_vm13 = vcmp.eq.f32.partialorder %v877_v8, inf  ;;  %vm425_vm14 = vcmp.eq.f32.partialorder %v877_v8, 0.0 }
  0xef   :  { %v701_v11 = vpop.eup %700  ;;  %v373_v13 = vmul.f32 %v699_v6, %v831_v30  ;;  %v392_v16 = vsel %vm390_vm2, %v391_v46, %v389_v12  ;;  %v550_v17 = vmul.f32 0.5, %v521_v7  ;;  %722 = vrsqrt.f32 %v898_v23 }
  0xf0   :  { %v703_v15 = vpop.eup %702  ;;  %v517_v18 = vmul.f32 0.6931472, %v701_v11  ;;  %v486_v20 = vmul.f32 0.25, %v392_v16  ;;  %724 = vlog2.f32 %v898_v23  ;;  %v334_v6 = vmul.f32 %v856_v59, %v856_v59 }
  0xf1   :  { %v705_v19 = vpop.eup %704  ;;  %v375_v21 = vsel %vm374_vm3, %v831_v30, %v373_v13  ;;  %v394_v22 = vmul.f32 %v703_v15, %v836_v35  ;;  %v566_v25 = vadd.f32 -1.3862944, %v550_v17  ;;  %v903_v29 = vpop.f32.mrb[12].mxu0  ;;  %v316_v7 = vmul.f32 %v858_v60, %v858_v60 }
  0xf2   :  { %v707_v24 = vpop.eup %706  ;;  %v378_v26 = vsel %vm376_vm4, %v377_v56, %v375_v21  ;;  %v548_v27 = vmul.f32 0.5, %v517_v18  ;;  %v523_v28 = vmul.f32 0.6931472, %v705_v19  ;;  %502 = vst [vmem:[%s1167_s3 + $0x10] sm:$0xff] %v486_v20  ;;  %v913_v30 = vpop.f32.mrb[12].mxu1  ;;  %v332_v16 = vmul.f32 %v864_v63, %v864_v63 }
  0xf3   :  { %v709_v31 = vpop.eup %708  ;;  %v484_v32 = vmul.f32 0.25, %v378_v26  ;;  %v396_v33 = vsel %vm395_vm5, %v836_v35, %v394_v22  ;;  %v380_v34 = vmul.f32 %v707_v24, %v838_v36  ;;  %v915_v37 = vpop.f32.mrb[13].mxu0  ;;  %582 = vst [vmem:[%s1168_s4 + $0x10] sm:$0xff] %v566_v25  ;;  %v350_v18 = vadd.f32 %v334_v6, %v879_v9 }
  0xf4   :  { %v564_v38 = vadd.f32 -1.3862944, %v548_v27  ;;  %v399_v39 = vsel %vm397_vm6, %v398_v62, %v396_v33  ;;  %v551_v40 = vmul.f32 0.5, %v523_v28  ;;  %v519_v41 = vmul.f32 0.6931472, %v709_v31  ;;  %v922_v42 = vpop.f32.mrb[13].mxu1  ;;  %v711_v47 = vpop.eup %710 }
  0xf5   :  { %500 = vst [vmem:[%s1167_s3] sm:$0xff] %v484_v32  ;;  %v487_v43 = vmul.f32 0.25, %v399_v39  ;;  %v382_v44 = vsel %vm381_vm7, %v838_v36, %v380_v34  ;;  %v932_v46 = vpop.f32.mrb[14].mxu0  ;;  %v934_v35 = vpop.f32.mrb[14].mxu1  ;;  %v415_v57 = vmul.f32 %v711_v47, %v850_v53  ;;  %v426_v62 = vand.u32 2147483648, %v877_v8 }
  0xf6   :  { %580 = vst [vmem:[%s1168_s4] sm:$0xff] %v564_v38  ;;  %v567_v48 = vadd.f32 -1.3862944, %v551_v40  ;;  %v385_v49 = vsel %vm383_vm8, %v384_v3, %v382_v44  ;;  %v549_v50 = vmul.f32 0.5, %v519_v41  ;;  %v942_v51 = vpop.f32.mrb[15].mxu0  ;;  %v944_v52 = vpop.f32.mrb[15].mxu1  ;;  %v319_v9 = vmul.f32 %v866_v0, %v866_v0 }
  0xf7   :  { %v713_v55 = vpop.eup %712  ;;  %503 = vst [vmem:[%s1167_s3 + $0x18] sm:$0xff] %v487_v43  ;;  %v485_v56 = vmul.f32 0.25, %v385_v49  ;;  %v417_v2 = vsel %vm416_vm9, %v850_v53, %v415_v57  ;;  %v990_v22 = vadd.f32 1e-09, %v350_v18  ;;  %v335_v26 = vmul.f32 %v872_v4, %v872_v4 }
  0xf8   :  { %v715_v36 = vpop.eup %714  ;;  %583 = vst [vmem:[%s1168_s4 + $0x18] sm:$0xff] %v567_v48  ;;  %v565_v58 = vadd.f32 -1.3862944, %v549_v50  ;;  %v529_v61 = vmul.f32 0.6931472, %v713_v55  ;;  %v420_v12 = vsel %vm418_vm10, %v419_v14, %v417_v2  ;;  %v348_v14 = vadd.f32 %v332_v16, %v316_v7 }
  0xf9   :  { %v717_v1 = vpop.eup %716  ;;  %501 = vst [vmem:[%s1167_s3 + $0x8] sm:$0xff] %v485_v56  ;;  %v401_v3 = vmul.f32 %v715_v36, %v852_v54  ;;  %v490_v17 = vmul.f32 0.25, %v420_v12  ;;  %726 = vrsqrt.f32 %v990_v22  ;;  %vm409_vm15 = vcmp.eq.f32.partialorder %v898_v23, inf }
  0xfa   :  { %v719_v11 = vpop.eup %718  ;;  %581 = vst [vmem:[%s1168_s4 + $0x8] sm:$0xff] %v565_v58  ;;  %v554_v13 = vmul.f32 0.5, %v529_v61  ;;  %v525_v15 = vmul.f32 0.6931472, %v717_v1  ;;  %v999_v25 = vadd.f32 1e-09, %v348_v14  ;;  %728 = vlog2.f32 %v990_v22 }
  0xfb   :  { %v403_v59 = vsel %vm402_vm11, %v852_v54, %v401_v3  ;;  %v422_v60 = vmul.f32 %v719_v11, %v877_v8  ;;  %506 = vst [vmem:[%s1167_s3 + $0x30] sm:$0xff] %v490_v17  ;;  %v721_v27 = vpop.eup %720  ;;  %vm411_vm0 = vcmp.eq.f32.partialorder %v898_v23, 0.0  ;;  %v412_v31 = vand.u32 2147483648, %v898_v23 }
  0xfc   :  { %v570_v19 = vadd.f32 -1.3862944, %v554_v13  ;;  %v406_v20 = vsel %vm404_vm12, %v405_v45, %v403_v59  ;;  %v552_v53 = vmul.f32 0.5, %v525_v15  ;;  %v723_v0 = vpop.eup %722  ;;  %730 = vrsqrt.f32 %v999_v25 }
  0xfd   :  { %v488_v63 = vmul.f32 0.25, %v406_v20  ;;  %v424_v21 = vsel %vm423_vm13, %v877_v8, %v422_v60  ;;  %v531_v8 = vmul.f32 0.6931472, %v721_v27  ;;  %v408_v4 = vmul.f32 %v723_v0, %v898_v23  ;;  %v725_v32 = vpop.eup %724 }
  0xfe   :  { %586 = vst [vmem:[%s1168_s4 + $0x30] sm:$0xff] %v570_v19  ;;  %v568_v54 = vadd.f32 -1.3862944, %v552_v53  ;;  %v427_v24 = vsel %vm425_vm14, %v426_v62, %v424_v21  ;;  %732 = vlog2.f32 %v999_v25  ;;  %v351_v34 = vadd.f32 %v335_v26, %v319_v9 }
  0xff   :  { %504 = vst [vmem:[%s1167_s3 + $0x20] sm:$0xff] %v488_v63  ;;  %v491_v28 = vmul.f32 0.25, %v427_v24  ;;  %v555_v33 = vmul.f32 0.5, %v531_v8  ;;  %v317_v38 = vmul.f32 %v874_v5, %v874_v5  ;;  %v410_v39 = vsel %vm409_vm15, %v898_v23, %v408_v4 }
 0x100   :  { %584 = vst [vmem:[%s1168_s4 + $0x20] sm:$0xff] %v568_v54  ;;  %v527_v40 = vmul.f32 0.6931472, %v725_v32  ;;  %v333_v41 = vmul.f32 %v881_v10, %v881_v10  ;;  %v322_v43 = vmul.f32 %v903_v29, %v903_v29  ;;  %v413_v45 = vsel %vm411_vm0, %v412_v31, %v410_v39 }
 0x101   :  { %507 = vst [vmem:[%s1167_s3 + $0x38] sm:$0xff] %v491_v28  ;;  %v571_v44 = vadd.f32 -1.3862944, %v555_v33  ;;  %v1027_v47 = vadd.f32 1e-09, %v351_v34  ;;  %v338_v48 = vmul.f32 %v913_v30, %v913_v30  ;;  %v489_v49 = vmul.f32 0.25, %v413_v45 }
 0x102   :  { %v553_v50 = vmul.f32 0.5, %v527_v40  ;;  %v349_v55 = vadd.f32 %v333_v41, %v317_v38  ;;  %v320_v5 = vmul.f32 %v915_v37, %v915_v37  ;;  %v336_v30 = vmul.f32 %v922_v42, %v922_v42 }
 0x103   :  { %587 = vst [vmem:[%s1168_s4 + $0x38] sm:$0xff] %v571_v44  ;;  %734 = vrsqrt.f32 %v1027_v47  ;;  %505 = vst [vmem:[%s1167_s3 + $0x28] sm:$0xff] %v489_v49  ;;  %v354_v29 = vadd.f32 %v338_v48, %v322_v43  ;;  %v323_v56 = vmul.f32 %v932_v46, %v932_v46  ;;  %v339_v57 = vmul.f32 %v934_v35, %v934_v35  ;;  %v727_v37 = vpop.eup %726 }
 0x104   :  { %v569_v10 = vadd.f32 -1.3862944, %v553_v50  ;;  %736 = vlog2.f32 %v1027_v47  ;;  %v1041_v23 = vadd.f32 1e-09, %v349_v55  ;;  %vm444_vm1 = vcmp.eq.f32.partialorder %v990_v22, inf  ;;  %v729_v42 = vpop.eup %728 }
 0x105   :  { %vm446_vm2 = vcmp.eq.f32.partialorder %v990_v22, 0.0  ;;  %v447_v36 = vand.u32 2147483648, %v990_v22  ;;  %v443_v58 = vmul.f32 %v727_v37, %v990_v22  ;;  %v1058_v46 = vadd.f32 1e-09, %v354_v29 }
 0x106   :  { %585 = vst [vmem:[%s1168_s4 + $0x28] sm:$0xff] %v569_v10  ;;  %738 = vrsqrt.f32 %v1041_v23  ;;  %v352_v35 = vadd.f32 %v336_v30, %v320_v5  ;;  %v731_v61 = vpop.eup %730  ;;  %v537_v62 = vmul.f32 0.6931472, %v729_v42  ;;  %vm430_vm3 = vcmp.eq.f32.partialorder %v999_v25, inf }
 0x107   :  { %740 = vlog2.f32 %v1041_v23  ;;  %v355_v1 = vadd.f32 %v339_v57, %v323_v56  ;;  %v321_v2 = vmul.f32 %v942_v51, %v942_v51  ;;  %v445_v6 = vsel %vm444_vm1, %v990_v22, %v443_v58 }
 0x108   :  { %v733_v3 = vpop.eup %732  ;;  %v429_v7 = vmul.f32 %v731_v61, %v999_v25  ;;  %742 = vrsqrt.f32 %v1058_v46  ;;  %v337_v11 = vmul.f32 %v944_v52, %v944_v52  ;;  %v448_v12 = vsel %vm446_vm2, %v447_v36, %v445_v6 }
 0x109   :  { %v558_v13 = vmul.f32 0.5, %v537_v62  ;;  %v433_v15 = vand.u32 2147483648, %v999_v25  ;;  %v533_v16 = vmul.f32 0.6931472, %v733_v3  ;;  %v494_v17 = vmul.f32 0.25, %v448_v12 }
 0x10a   :  { %v431_v51 = vsel %vm430_vm3, %v999_v25, %v429_v7  ;;  %vm432_vm4 = vcmp.eq.f32.partialorder %v999_v25, 0.0  ;;  %744 = vlog2.f32 %v1058_v46  ;;  %v1074_v19 = vadd.f32 1e-09, %v352_v35 }
 0x10b   :  { %v574_v59 = vadd.f32 -1.3862944, %v558_v13  ;;  %v434_v60 = vsel %vm432_vm4, %v433_v15, %v431_v51  ;;  %v556_v18 = vmul.f32 0.5, %v533_v16  ;;  %510 = vst [vmem:[%s1167_s3 + $0x50] sm:$0xff] %v494_v17  ;;  %v1079_v53 = vadd.f32 1e-09, %v355_v1 }
 0x10c   :  { %v492_v20 = vmul.f32 0.25, %v434_v60  ;;  %v353_v14 = vadd.f32 %v337_v11, %v321_v2  ;;  %746 = vrsqrt.f32 %v1074_v19  ;;  %vm451_vm5 = vcmp.eq.f32.partialorder %v1027_v47, inf }
 0x10d   :  { %v735_v52 = vpop.eup %734  ;;  %590 = vst [vmem:[%s1168_s4 + $0x50] sm:$0xff] %v574_v59  ;;  %v572_v21 = vadd.f32 -1.3862944, %v556_v18  ;;  %v454_v9 = vand.u32 2147483648, %v1027_v47  ;;  %748 = vlog2.f32 %v1074_v19  ;;  %vm453_vm6 = vcmp.eq.f32.partialorder %v1027_v47, 0.0 }
 0x10e   :  { %v737_v63 = vpop.eup %736  ;;  %v450_v22 = vmul.f32 %v735_v52, %v1027_v47  ;;  %508 = vst [vmem:[%s1167_s3 + $0x40] sm:$0xff] %v492_v20  ;;  %vm437_vm7 = vcmp.eq.f32.partialorder %v1041_v23, inf  ;;  %750 = vrsqrt.f32 %v1079_v53  ;;  %v440_v8 = vand.u32 2147483648, %v1041_v23 }
 0x10f   :  { %v539_v54 = vmul.f32 0.6931472, %v737_v63  ;;  %588 = vst [vmem:[%s1168_s4 + $0x40] sm:$0xff] %v572_v21  ;;  %752 = vlog2.f32 %v1079_v53  ;;  %v1102_v32 = vadd.f32 1e-09, %v353_v14  ;;  %vm439_vm8 = vcmp.eq.f32.partialorder %v1041_v23, 0.0 }
 0x110   :  { %v739_v24 = vpop.eup %738  ;;  %v452_v25 = vsel %vm451_vm5, %v1027_v47, %v450_v22  ;;  %vm472_vm9 = vcmp.eq.f32.partialorder %v1058_v46, inf  ;;  %vm474_vm10 = vcmp.eq.f32.partialorder %v1058_v46, 0.0  ;;  %v475_v45 = vand.u32 2147483648, %v1058_v46 }
 0x111   :  { %v741_v26 = vpop.eup %740  ;;  %v455_v27 = vsel %vm453_vm6, %v454_v9, %v452_v25  ;;  %v559_v28 = vmul.f32 0.5, %v539_v54  ;;  %v436_v0 = vmul.f32 %v739_v24, %v1041_v23  ;;  %754 = vrsqrt.f32 %v1102_v32 }
 0x112   :  { %v495_v4 = vmul.f32 0.25, %v455_v27  ;;  %v535_v31 = vmul.f32 0.6931472, %v741_v26  ;;  %v743_v33 = vpop.eup %742  ;;  %756 = vlog2.f32 %v1102_v32  ;;  %vm458_vm11 = vcmp.eq.f32.partialorder %v1074_v19, inf }
 0x113   :  { %v575_v34 = vadd.f32 -1.3862944, %v559_v28  ;;  %v438_v38 = vsel %vm437_vm7, %v1041_v23, %v436_v0  ;;  %v471_v41 = vmul.f32 %v743_v33, %v1058_v46  ;;  %v461_v57 = vand.u32 2147483648, %v1074_v19 }
 0x114   :  { %511 = vst [vmem:[%s1167_s3 + $0x58] sm:$0xff] %v495_v4  ;;  %v441_v39 = vsel %vm439_vm8, %v440_v8, %v438_v38  ;;  %v557_v40 = vmul.f32 0.5, %v535_v31  ;;  %v745_v43 = vpop.eup %744  ;;  %vm460_vm12 = vcmp.eq.f32.partialorder %v1074_v19, 0.0  ;;  %vm479_vm13 = vcmp.eq.f32.partialorder %v1079_v53, inf }
 0x115   :  { %591 = vst [vmem:[%s1168_s4 + $0x58] sm:$0xff] %v575_v34  ;;  %v493_v44 = vmul.f32 0.25, %v441_v39  ;;  %v473_v48 = vsel %vm472_vm9, %v1058_v46, %v471_v41  ;;  %v545_v49 = vmul.f32 0.6931472, %v745_v43  ;;  %v482_v61 = vand.u32 2147483648, %v1079_v53 }
 0x116   :  { %v573_v47 = vadd.f32 -1.3862944, %v557_v40  ;;  %v476_v50 = vsel %vm474_vm10, %v475_v45, %v473_v48  ;;  %v747_v55 = vpop.eup %746  ;;  %vm481_vm14 = vcmp.eq.f32.partialorder %v1079_v53, 0.0  ;;  %vm465_vm15 = vcmp.eq.f32.partialorder %v1102_v32, inf }
 0x117   :  { %509 = vst [vmem:[%s1167_s3 + $0x48] sm:$0xff] %v493_v44  ;;  %v498_v5 = vmul.f32 0.25, %v476_v50  ;;  %v562_v10 = vmul.f32 0.5, %v545_v49  ;;  %v749_v23 = vpop.eup %748  ;;  %v457_v29 = vmul.f32 %v747_v55, %v1074_v19  ;;  %v468_v16 = vand.u32 2147483648, %v1102_v32 }
 0x118   :  { %589 = vst [vmem:[%s1168_s4 + $0x48] sm:$0xff] %v573_v47  ;;  %v751_v30 = vpop.eup %750  ;;  %v541_v37 = vmul.f32 0.6931472, %v749_v23  ;;  %vm467_vm0 = vcmp.eq.f32.partialorder %v1102_v32, 0.0 }
 0x119   :  { %514 = vst [vmem:[%s1167_s3 + $0x70] sm:$0xff] %v498_v5  ;;  %v578_v56 = vadd.f32 -1.3862944, %v562_v10  ;;  %v459_v36 = vsel %vm458_vm11, %v1074_v19, %v457_v29  ;;  %v478_v42 = vmul.f32 %v751_v30, %v1079_v53  ;;  %v753_v58 = vpop.eup %752 }
 0x11a   :  { %v462_v46 = vsel %vm460_vm12, %v461_v57, %v459_v36  ;;  %v560_v35 = vmul.f32 0.5, %v541_v37  ;;  %v547_v2 = vmul.f32 0.6931472, %v753_v58 }
 0x11b   :  { %594 = vst [vmem:[%s1168_s4 + $0x70] sm:$0xff] %v578_v56  ;;  %v496_v62 = vmul.f32 0.25, %v462_v46  ;;  %v480_v1 = vsel %vm479_vm13, %v1079_v53, %v478_v42  ;;  %v755_v3 = vpop.eup %754 }
 0x11c   :  { %v576_v6 = vadd.f32 -1.3862944, %v560_v35  ;;  %v483_v7 = vsel %vm481_vm14, %v482_v61, %v480_v1  ;;  %v563_v12 = vmul.f32 0.5, %v547_v2  ;;  %v464_v13 = vmul.f32 %v755_v3, %v1102_v32  ;;  %v757_v15 = vpop.eup %756 }
 0x11d   :  { %512 = vst [vmem:[%s1167_s3 + $0x60] sm:$0xff] %v496_v62  ;;  %v499_v11 = vmul.f32 0.25, %v483_v7  ;;  %v543_v59 = vmul.f32 0.6931472, %v757_v15 }
 0x11e   :  { %592 = vst [vmem:[%s1168_s4 + $0x60] sm:$0xff] %v576_v6  ;;  %v579_v17 = vadd.f32 -1.3862944, %v563_v12  ;;  %v466_v51 = vsel %vm465_vm15, %v1102_v32, %v464_v13 }
 0x11f   :  { %515 = vst [vmem:[%s1167_s3 + $0x78] sm:$0xff] %v499_v11  ;;  %v469_v60 = vsel %vm467_vm0, %v468_v16, %v466_v51  ;;  %v561_v19 = vmul.f32 0.5, %v543_v59 }
 0x120   :  { %595 = vst [vmem:[%s1168_s4 + $0x78] sm:$0xff] %v579_v17  ;;  %v497_v18 = vmul.f32 0.25, %v469_v60 }
 0x121   :  { %v577_v52 = vadd.f32 -1.3862944, %v561_v19 }
 0x122   :  { %513 = vst [vmem:[%s1167_s3 + $0x68] sm:$0xff] %v497_v18 }
 0x123   :  { %593 = vst [vmem:[%s1168_s4 + $0x68] sm:$0xff] %v577_v52 }

// kernel: _resolution_forward.9
= control target key start
LH: loop header
LB: loop body
LE: loop exit
PB: predicated region body
PF: predicated region fallthrough
CT: control target
= control target key end

     0   :  { %s1141_s12 = smov 0   ;;  %s1143_s13 = smov 0   ;;  %s1289_s0 = inlined_call_operand.vmem [shape: bf16[1280,18], index: 0, kind: input, shape index: {}]   ;;  %s1290_s1 = inlined_call_operand.vmem [shape: bf16[18,128], index: 1, kind: input, shape index: {}]   ;;  %s1291_s2 = inlined_call_operand.vmem [shape: f32[1,128], index: 2, kind: input, shape index: {}]   ;;  %s1292_s3 = inlined_call_operand.vmem [shape: f32[1280,128], index: 3, kind: output, shape index: {}]  }
   0x1   :  { %s1145_s14 = smov 0  }
   0x2 LB: > { %s32_s15 = sadd.s32 1, %s1115_s13  ;;  %p953_p0 = scmp.ge.s32.totalorder %s1119_s14, 1  ;;  %s1119_s14 = sphi %s1145_s14, %s13_s14   ;;  %s1115_s13 = sphi %s1143_s13, %s1294_s13   ;;  %s1111_s12 = sphi %s1141_s12, %s1293_s12  }
   0x3   : > { %p34_p1 = scmp.ge.s32.totalorder %s32_s15, 5  ;;  %p188_p2 = scmp.lt.s32.totalorder %s1119_s14, 6 }
   0x5   : > { %s1296_s15 = smov (%p34_p1, %s32_s15), 0  ;;  %p189_p3 = pnand %p953_p0, %p188_p2 }
   0x6   : > { %v1079_v0 = vld [vmem:[%s1290_s1] sm:$0xff] (!%p189_p3)   ;;  %vm501_vm0 = vcmask (!%p189_p3), 1040384   ;;  %v1080_v1 = vld [vmem:[%s1290_s1 + $0x8] ss:$0 sps:$4 sm:$0x11] (!%p189_p3)   ;;  %s954_s20 = sshll.u32 (!%p189_p3), %s1111_s12, 5 }
   0x7   : > { %192 = sbr.rel (%p189_p3) target bundleno = 262 (0x106), region = 32  ;;  %1013 = vmatprep.subr.bf16.mxu0 (!%p189_p3), %v1079_v0  ;;  %1049 = vmatprep.subr.bf16.mxu1 (!%p189_p3), %v1079_v0  ;;  %p230_p4 = scmp.lt.s32.totalorder (!%p189_p3), %s954_s20, 159  ;;  %v503_v2 = vsel (!%p189_p3), %vm501_vm0, %v1080_v1, 0  ;;  %vm452_vm1 = vcmask (!%p189_p3), 146432   ;;  %v1209_v19 = vld [vmem:[%s1291_s2] ss:$0 sm:$0xff] (!%p189_p3) }
   0x8   : > { %1014 = vmatpush3.bf16.msra.mxu0 (!%p189_p3), %v1079_v0  ;;  %1051 = vmatpush3.bf16.msra.mxu1 (!%p189_p3), %v1079_v0 }
   0x9   : > { %1053 = vmatprep.subr.msk.bf16.mxu0 (!%p189_p3), %vm501_vm0, %v1080_v1  ;;  %1054 = vmatprep.subr.msk.bf16.mxu1 (!%p189_p3), %vm501_vm0, %v1080_v1 }
   0xc   : > { %1016 = vmatpush3.bf16.msra.mxu0 (!%p189_p3), %v503_v2  ;;  %1052 = vmatpush3.bf16.msra.mxu1 (!%p189_p3), %v503_v2 }
   0xe   : > { %s1298_s20 = smov (!%p230_p4, %s954_s20), 159 }
   0xf   : > { %s955_s21 = sshll.u32 %s1298_s20, 2  ;;  %s957_s25 = sshll.u32 %s1298_s20, 3 }
  0x10   : > { %s1171_s24 = scalar_lea.vmem %s1289_s0, %s955_s21  ;;  %s1214_s30 = scalar_lea.vmem %s1292_s3, %s957_s25 }
  0x11   : > { %v1081_v3 = vld [vmem:[%s1171_s24] sm:$0xff]   ;;  %v1083_v5 = vld [vmem:[%s1171_s24 + $0x8] sm:$0xff]   ;;  %v1085_v7 = vld [vmem:[%s1171_s24 + $0x10] sm:$0xff]  }
  0x12   : > { %v1082_v4 = vld [vmem:[%s1171_s24 + $0x40] sm:$0xff]   ;;  %1017 = vmatprep.mubr.msk.bf16.mxu0 %vm452_vm1, %v1081_v3  ;;  %v1084_v6 = vld [vmem:[%s1171_s24 + $0x48] sm:$0xff]   ;;  %v1086_v8 = vld [vmem:[%s1171_s24 + $0x50] sm:$0xff]  }
  0x13   : > { %1033 = vmatprep.mubr.msk.bf16.mxu1 %vm452_vm1, %v1082_v4  ;;  %1018 = vmatmul.mubr.msk.bf16.vlgmr.msra.gmra.mrb[0].mxu0 %vm452_vm1, %v1083_v5  ;;  %v1087_v9 = vld [vmem:[%s1171_s24 + $0x18] sm:$0xff]   ;;  %v1089_v11 = vld [vmem:[%s1171_s24 + $0x20] sm:$0xff]   ;;  %v1091_v13 = vld [vmem:[%s1171_s24 + $0x28] sm:$0xff]  }
  0x14   : > { %1034 = vmatmul.mubr.msk.bf16.vlgmr.msra.gmra.mrb[0].mxu1 %vm452_vm1, %v1084_v6  ;;  %1021 = vmatprep.mubr.msk.bf16.mxu0 %vm452_vm1, %v1085_v7  ;;  %v1088_v10 = vld [vmem:[%s1171_s24 + $0x58] sm:$0xff]   ;;  %v1090_v12 = vld [vmem:[%s1171_s24 + $0x60] sm:$0xff]   ;;  %v1092_v14 = vld [vmem:[%s1171_s24 + $0x68] sm:$0xff]  }
  0x15   : > { %1037 = vmatprep.mubr.msk.bf16.mxu1 %vm452_vm1, %v1086_v8  ;;  %v1093_v15 = vld [vmem:[%s1171_s24 + $0x30] sm:$0xff]   ;;  %v1095_v17 = vld [vmem:[%s1171_s24 + $0x38] sm:$0xff]  }
  0x16   : > { %v1094_v16 = vld [vmem:[%s1171_s24 + $0x70] sm:$0xff]   ;;  %v1096_v18 = vld [vmem:[%s1171_s24 + $0x78] sm:$0xff]  }
  0x1b   : > { %1022 = vmatmul.mubr.msk.bf16.gmra.mrb[4].mxu0 %vm452_vm1, %v1087_v9 }
  0x1c   : > { %1038 = vmatmul.mubr.msk.bf16.gmra.mrb[4].mxu1 %vm452_vm1, %v1088_v10  ;;  %1025 = vmatprep.mubr.msk.bf16.mxu0 %vm452_vm1, %v1089_v11 }
  0x1d   : > { %1041 = vmatprep.mubr.msk.bf16.mxu1 %vm452_vm1, %v1090_v12 }
  0x23   : > { %1026 = vmatmul.mubr.msk.bf16.gmra.mrb[8].mxu0 %vm452_vm1, %v1091_v13 }
  0x24   : > { %1042 = vmatmul.mubr.msk.bf16.gmra.mrb[8].mxu1 %vm452_vm1, %v1092_v14  ;;  %1029 = vmatprep.mubr.msk.bf16.mxu0 %vm452_vm1, %v1093_v15 }
  0x25   : > { %1045 = vmatprep.mubr.msk.bf16.mxu1 %vm452_vm1, %v1094_v16 }
  0x2b   : > { %1030 = vmatmul.mubr.msk.bf16.gmra.mrb[12].mxu0 %vm452_vm1, %v1095_v17 }
  0x2c   : > { %1046 = vmatmul.mubr.msk.bf16.gmra.mrb[12].mxu1 %vm452_vm1, %v1096_v18 }
  0xe6   : > { %v1019_v20 = vpop.f32.mrb[0].mxu0 }
  0xe7   : > { %v774_v21 = vadd.f32 %v1019_v20, %v1209_v19  ;;  %v1035_v22 = vpop.f32.mrb[0].mxu1  ;;  %v539_v23 = vpop.f32.mrb[1].mxu0 }
  0xe8   : > { %v790_v24 = vadd.f32 %v1035_v22, %v1209_v19  ;;  %v772_v25 = vadd.f32 %v1209_v19, %v539_v23  ;;  %v603_v26 = vpop.f32.mrb[1].mxu1  ;;  %v1020_v27 = vpop.f32.mrb[2].mxu0 }
  0xe9   : > { %806 = vst [vmem:[%s1214_s30 + $0x10] sm:$0xff] %v774_v21  ;;  %v788_v28 = vadd.f32 %v1209_v19, %v603_v26  ;;  %v775_v29 = vadd.f32 %v1020_v27, %v1209_v19  ;;  %v1036_v30 = vpop.f32.mrb[2].mxu1  ;;  %v542_v31 = vpop.f32.mrb[3].mxu0 }
  0xea   : > { %822 = vst [vmem:[%s1214_s30 + $0x90] sm:$0xff] %v790_v24  ;;  %804 = vst [vmem:[%s1214_s30] sm:$0xff] %v772_v25  ;;  %v791_v32 = vadd.f32 %v1036_v30, %v1209_v19  ;;  %v773_v33 = vadd.f32 %v1209_v19, %v542_v31  ;;  %v606_v34 = vpop.f32.mrb[3].mxu1 }
  0xeb   : > { %820 = vst [vmem:[%s1214_s30 + $0x80] sm:$0xff] %v788_v28  ;;  %807 = vst [vmem:[%s1214_s30 + $0x18] sm:$0xff] %v775_v29  ;;  %v789_v35 = vadd.f32 %v1209_v19, %v606_v34 }
  0xec   : > { %823 = vst [vmem:[%s1214_s30 + $0x98] sm:$0xff] %v791_v32  ;;  %805 = vst [vmem:[%s1214_s30 + $0x8] sm:$0xff] %v773_v33 }
  0xed   : > { %821 = vst [vmem:[%s1214_s30 + $0x88] sm:$0xff] %v789_v35 }
  0xee   : > { %v1023_v36 = vpop.f32.mrb[4].mxu0 }
  0xef   : > { %v778_v37 = vadd.f32 %v1023_v36, %v1209_v19  ;;  %v1039_v38 = vpop.f32.mrb[4].mxu1  ;;  %v555_v39 = vpop.f32.mrb[5].mxu0 }
  0xf0   : > { %v794_v40 = vadd.f32 %v1039_v38, %v1209_v19  ;;  %v776_v41 = vadd.f32 %v1209_v19, %v555_v39  ;;  %v619_v42 = vpop.f32.mrb[5].mxu1  ;;  %v1024_v43 = vpop.f32.mrb[6].mxu0 }
  0xf1   : > { %810 = vst [vmem:[%s1214_s30 + $0x30] sm:$0xff] %v778_v37  ;;  %v792_v44 = vadd.f32 %v1209_v19, %v619_v42  ;;  %v779_v45 = vadd.f32 %v1024_v43, %v1209_v19  ;;  %v1040_v46 = vpop.f32.mrb[6].mxu1  ;;  %v558_v47 = vpop.f32.mrb[7].mxu0 }
  0xf2   : > { %826 = vst [vmem:[%s1214_s30 + $0xb0] sm:$0xff] %v794_v40  ;;  %808 = vst [vmem:[%s1214_s30 + $0x20] sm:$0xff] %v776_v41  ;;  %v795_v48 = vadd.f32 %v1040_v46, %v1209_v19  ;;  %v777_v49 = vadd.f32 %v1209_v19, %v558_v47  ;;  %v622_v50 = vpop.f32.mrb[7].mxu1 }
  0xf3   : > { %824 = vst [vmem:[%s1214_s30 + $0xa0] sm:$0xff] %v792_v44  ;;  %811 = vst [vmem:[%s1214_s30 + $0x38] sm:$0xff] %v779_v45  ;;  %v793_v51 = vadd.f32 %v1209_v19, %v622_v50 }
  0xf4   : > { %827 = vst [vmem:[%s1214_s30 + $0xb8] sm:$0xff] %v795_v48  ;;  %809 = vst [vmem:[%s1214_s30 + $0x28] sm:$0xff] %v777_v49 }
  0xf5   : > { %825 = vst [vmem:[%s1214_s30 + $0xa8] sm:$0xff] %v793_v51 }
  0xf6   : > { %v1027_v52 = vpop.f32.mrb[8].mxu0 }
  0xf7   : > { %v782_v53 = vadd.f32 %v1027_v52, %v1209_v19  ;;  %v1043_v54 = vpop.f32.mrb[8].mxu1  ;;  %v571_v55 = vpop.f32.mrb[9].mxu0 }
  0xf8   : > { %v798_v56 = vadd.f32 %v1043_v54, %v1209_v19  ;;  %v780_v57 = vadd.f32 %v1209_v19, %v571_v55  ;;  %v635_v58 = vpop.f32.mrb[9].mxu1  ;;  %v1028_v59 = vpop.f32.mrb[10].mxu0 }
  0xf9   : > { %814 = vst [vmem:[%s1214_s30 + $0x50] sm:$0xff] %v782_v53  ;;  %v796_v60 = vadd.f32 %v1209_v19, %v635_v58  ;;  %v783_v61 = vadd.f32 %v1028_v59, %v1209_v19  ;;  %v1044_v62 = vpop.f32.mrb[10].mxu1  ;;  %v574_v63 = vpop.f32.mrb[11].mxu0 }
  0xfa   : > { %830 = vst [vmem:[%s1214_s30 + $0xd0] sm:$0xff] %v798_v56  ;;  %812 = vst [vmem:[%s1214_s30 + $0x40] sm:$0xff] %v780_v57  ;;  %v799_v0 = vadd.f32 %v1044_v62, %v1209_v19  ;;  %v781_v1 = vadd.f32 %v1209_v19, %v574_v63  ;;  %v638_v2 = vpop.f32.mrb[11].mxu1 }
  0xfb   : > { %828 = vst [vmem:[%s1214_s30 + $0xc0] sm:$0xff] %v796_v60  ;;  %815 = vst [vmem:[%s1214_s30 + $0x58] sm:$0xff] %v783_v61  ;;  %v797_v3 = vadd.f32 %v1209_v19, %v638_v2 }
  0xfc   : > { %831 = vst [vmem:[%s1214_s30 + $0xd8] sm:$0xff] %v799_v0  ;;  %813 = vst [vmem:[%s1214_s30 + $0x48] sm:$0xff] %v781_v1 }
  0xfd   : > { %829 = vst [vmem:[%s1214_s30 + $0xc8] sm:$0xff] %v797_v3 }
  0xfe   : > { %v1031_v4 = vpop.f32.mrb[12].mxu0 }
  0xff   : > { %v786_v5 = vadd.f32 %v1031_v4, %v1209_v19  ;;  %v1047_v6 = vpop.f32.mrb[12].mxu1  ;;  %v587_v7 = vpop.f32.mrb[13].mxu0 }
 0x100   : > { %v802_v8 = vadd.f32 %v1047_v6, %v1209_v19  ;;  %v784_v9 = vadd.f32 %v1209_v19, %v587_v7  ;;  %v651_v10 = vpop.f32.mrb[13].mxu1  ;;  %v1032_v11 = vpop.f32.mrb[14].mxu0 }
 0x101   : > { %818 = vst [vmem:[%s1214_s30 + $0x70] sm:$0xff] %v786_v5  ;;  %v800_v12 = vadd.f32 %v1209_v19, %v651_v10  ;;  %v787_v13 = vadd.f32 %v1032_v11, %v1209_v19  ;;  %v1048_v14 = vpop.f32.mrb[14].mxu1  ;;  %v590_v15 = vpop.f32.mrb[15].mxu0 }
 0x102   : > { %834 = vst [vmem:[%s1214_s30 + $0xf0] sm:$0xff] %v802_v8  ;;  %816 = vst [vmem:[%s1214_s30 + $0x60] sm:$0xff] %v784_v9  ;;  %v803_v16 = vadd.f32 %v1048_v14, %v1209_v19  ;;  %v785_v17 = vadd.f32 %v1209_v19, %v590_v15  ;;  %v654_v18 = vpop.f32.mrb[15].mxu1 }
 0x103   : > { %832 = vst [vmem:[%s1214_s30 + $0xe0] sm:$0xff] %v800_v12  ;;  %819 = vst [vmem:[%s1214_s30 + $0x78] sm:$0xff] %v787_v13  ;;  %v801_v20 = vadd.f32 %v1209_v19, %v654_v18 }
 0x104   : > { %835 = vst [vmem:[%s1214_s30 + $0xf8] sm:$0xff] %v803_v16  ;;  %817 = vst [vmem:[%s1214_s30 + $0x68] sm:$0xff] %v785_v17 }
 0x105   : > { %833 = vst [vmem:[%s1214_s30 + $0xe8] sm:$0xff] %v801_v20 }
 0x106 PF: > { %s13_s14 = sadd.s32 1, %s1119_s14   ;;  %s1293_s12 = smov %s1115_s13 }
 0x107   : > { %p10_p5 = scmp.ge.s32.totalorder %s13_s14, 7   ;;  %s1294_s13 = smov %s1296_s15 }
 0x109   :  { %12 = sbr.rel (!%p10_p5) target bundleno = 2 (0x2), region = 76 }

// kernel: _resolution_forward.10
= control target key start
LH: loop header
LB: loop body
LE: loop exit
PB: predicated region body
PF: predicated region fallthrough
CT: control target
= control target key end

     0   :  { %s1141_s12 = smov 0   ;;  %s1143_s13 = smov 0   ;;  %s1289_s0 = inlined_call_operand.vmem [shape: bf16[512,18], index: 0, kind: input, shape index: {}]   ;;  %s1290_s1 = inlined_call_operand.vmem [shape: bf16[18,128], index: 1, kind: input, shape index: {}]   ;;  %s1291_s2 = inlined_call_operand.vmem [shape: f32[1,128], index: 2, kind: input, shape index: {}]   ;;  %s1292_s3 = inlined_call_operand.vmem [shape: f32[512,128], index: 3, kind: output, shape index: {}]  }
   0x1   :  { %s1145_s14 = smov 0  }
   0x2 LB: > { %s32_s15 = sadd.s32 1, %s1115_s13  ;;  %p953_p0 = scmp.ge.s32.totalorder %s1119_s14, 1  ;;  %s1119_s14 = sphi %s1145_s14, %s13_s14   ;;  %s1115_s13 = sphi %s1143_s13, %s1294_s13   ;;  %s1111_s12 = sphi %s1141_s12, %s1293_s12  }
   0x3   : > { %p34_p1 = scmp.ge.s32.totalorder %s32_s15, 2  ;;  %p188_p2 = scmp.lt.s32.totalorder %s1119_s14, 3 }
   0x5   : > { %s1296_s15 = smov (%p34_p1, %s32_s15), 0  ;;  %p189_p3 = pnand %p953_p0, %p188_p2 }
   0x6   : > { %v1079_v0 = vld [vmem:[%s1290_s1] sm:$0xff] (!%p189_p3)   ;;  %vm501_vm0 = vcmask (!%p189_p3), 1040384   ;;  %v1080_v1 = vld [vmem:[%s1290_s1 + $0x8] ss:$0 sps:$4 sm:$0x11] (!%p189_p3)   ;;  %s954_s20 = sshll.u32 (!%p189_p3), %s1111_s12, 5 }
   0x7   : > { %192 = sbr.rel (%p189_p3) target bundleno = 262 (0x106), region = 32  ;;  %1013 = vmatprep.subr.bf16.mxu0 (!%p189_p3), %v1079_v0  ;;  %1049 = vmatprep.subr.bf16.mxu1 (!%p189_p3), %v1079_v0  ;;  %p230_p4 = scmp.lt.s32.totalorder (!%p189_p3), %s954_s20, 63  ;;  %v503_v2 = vsel (!%p189_p3), %vm501_vm0, %v1080_v1, 0  ;;  %vm452_vm1 = vcmask (!%p189_p3), 146432   ;;  %v1209_v19 = vld [vmem:[%s1291_s2] ss:$0 sm:$0xff] (!%p189_p3) }
   0x8   : > { %1014 = vmatpush3.bf16.msra.mxu0 (!%p189_p3), %v1079_v0  ;;  %1051 = vmatpush3.bf16.msra.mxu1 (!%p189_p3), %v1079_v0 }
   0x9   : > { %1053 = vmatprep.subr.msk.bf16.mxu0 (!%p189_p3), %vm501_vm0, %v1080_v1  ;;  %1054 = vmatprep.subr.msk.bf16.mxu1 (!%p189_p3), %vm501_vm0, %v1080_v1 }
   0xc   : > { %1016 = vmatpush3.bf16.msra.mxu0 (!%p189_p3), %v503_v2  ;;  %1052 = vmatpush3.bf16.msra.mxu1 (!%p189_p3), %v503_v2 }
   0xe   : > { %s1298_s20 = smov (!%p230_p4, %s954_s20), 63 }
   0xf   : > { %s955_s21 = sshll.u32 %s1298_s20, 2  ;;  %s957_s25 = sshll.u32 %s1298_s20, 3 }
  0x10   : > { %s1171_s24 = scalar_lea.vmem %s1289_s0, %s955_s21  ;;  %s1214_s30 = scalar_lea.vmem %s1292_s3, %s957_s25 }
  0x11   : > { %v1081_v3 = vld [vmem:[%s1171_s24] sm:$0xff]   ;;  %v1083_v5 = vld [vmem:[%s1171_s24 + $0x8] sm:$0xff]   ;;  %v1085_v7 = vld [vmem:[%s1171_s24 + $0x10] sm:$0xff]  }
  0x12   : > { %v1082_v4 = vld [vmem:[%s1171_s24 + $0x40] sm:$0xff]   ;;  %1017 = vmatprep.mubr.msk.bf16.mxu0 %vm452_vm1, %v1081_v3  ;;  %v1084_v6 = vld [vmem:[%s1171_s24 + $0x48] sm:$0xff]   ;;  %v1086_v8 = vld [vmem:[%s1171_s24 + $0x50] sm:$0xff]  }
  0x13   : > { %1033 = vmatprep.mubr.msk.bf16.mxu1 %vm452_vm1, %v1082_v4  ;;  %1018 = vmatmul.mubr.msk.bf16.vlgmr.msra.gmra.mrb[0].mxu0 %vm452_vm1, %v1083_v5  ;;  %v1087_v9 = vld [vmem:[%s1171_s24 + $0x18] sm:$0xff]   ;;  %v1089_v11 = vld [vmem:[%s1171_s24 + $0x20] sm:$0xff]   ;;  %v1091_v13 = vld [vmem:[%s1171_s24 + $0x28] sm:$0xff]  }
  0x14   : > { %1034 = vmatmul.mubr.msk.bf16.vlgmr.msra.gmra.mrb[0].mxu1 %vm452_vm1, %v1084_v6  ;;  %1021 = vmatprep.mubr.msk.bf16.mxu0 %vm452_vm1, %v1085_v7  ;;  %v1088_v10 = vld [vmem:[%s1171_s24 + $0x58] sm:$0xff]   ;;  %v1090_v12 = vld [vmem:[%s1171_s24 + $0x60] sm:$0xff]   ;;  %v1092_v14 = vld [vmem:[%s1171_s24 + $0x68] sm:$0xff]  }
  0x15   : > { %1037 = vmatprep.mubr.msk.bf16.mxu1 %vm452_vm1, %v1086_v8  ;;  %v1093_v15 = vld [vmem:[%s1171_s24 + $0x30] sm:$0xff]   ;;  %v1095_v17 = vld [vmem:[%s1171_s24 + $0x38] sm:$0xff]  }
  0x16   : > { %v1094_v16 = vld [vmem:[%s1171_s24 + $0x70] sm:$0xff]   ;;  %v1096_v18 = vld [vmem:[%s1171_s24 + $0x78] sm:$0xff]  }
  0x1b   : > { %1022 = vmatmul.mubr.msk.bf16.gmra.mrb[4].mxu0 %vm452_vm1, %v1087_v9 }
  0x1c   : > { %1038 = vmatmul.mubr.msk.bf16.gmra.mrb[4].mxu1 %vm452_vm1, %v1088_v10  ;;  %1025 = vmatprep.mubr.msk.bf16.mxu0 %vm452_vm1, %v1089_v11 }
  0x1d   : > { %1041 = vmatprep.mubr.msk.bf16.mxu1 %vm452_vm1, %v1090_v12 }
  0x23   : > { %1026 = vmatmul.mubr.msk.bf16.gmra.mrb[8].mxu0 %vm452_vm1, %v1091_v13 }
  0x24   : > { %1042 = vmatmul.mubr.msk.bf16.gmra.mrb[8].mxu1 %vm452_vm1, %v1092_v14  ;;  %1029 = vmatprep.mubr.msk.bf16.mxu0 %vm452_vm1, %v1093_v15 }
  0x25   : > { %1045 = vmatprep.mubr.msk.bf16.mxu1 %vm452_vm1, %v1094_v16 }
  0x2b   : > { %1030 = vmatmul.mubr.msk.bf16.gmra.mrb[12].mxu0 %vm452_vm1, %v1095_v17 }
  0x2c   : > { %1046 = vmatmul.mubr.msk.bf16.gmra.mrb[12].mxu1 %vm452_vm1, %v1096_v18 }
  0xe6   : > { %v1019_v20 = vpop.f32.mrb[0].mxu0 }
  0xe7   : > { %v774_v21 = vadd.f32 %v1019_v20, %v1209_v19  ;;  %v1035_v22 = vpop.f32.mrb[0].mxu1  ;;  %v539_v23 = vpop.f32.mrb[1].mxu0 }
  0xe8   : > { %v790_v24 = vadd.f32 %v1035_v22, %v1209_v19  ;;  %v772_v25 = vadd.f32 %v1209_v19, %v539_v23  ;;  %v603_v26 = vpop.f32.mrb[1].mxu1  ;;  %v1020_v27 = vpop.f32.mrb[2].mxu0 }
  0xe9   : > { %806 = vst [vmem:[%s1214_s30 + $0x10] sm:$0xff] %v774_v21  ;;  %v788_v28 = vadd.f32 %v1209_v19, %v603_v26  ;;  %v775_v29 = vadd.f32 %v1020_v27, %v1209_v19  ;;  %v1036_v30 = vpop.f32.mrb[2].mxu1  ;;  %v542_v31 = vpop.f32.mrb[3].mxu0 }
  0xea   : > { %822 = vst [vmem:[%s1214_s30 + $0x90] sm:$0xff] %v790_v24  ;;  %804 = vst [vmem:[%s1214_s30] sm:$0xff] %v772_v25  ;;  %v791_v32 = vadd.f32 %v1036_v30, %v1209_v19  ;;  %v773_v33 = vadd.f32 %v1209_v19, %v542_v31  ;;  %v606_v34 = vpop.f32.mrb[3].mxu1 }
  0xeb   : > { %820 = vst [vmem:[%s1214_s30 + $0x80] sm:$0xff] %v788_v28  ;;  %807 = vst [vmem:[%s1214_s30 + $0x18] sm:$0xff] %v775_v29  ;;  %v789_v35 = vadd.f32 %v1209_v19, %v606_v34 }
  0xec   : > { %823 = vst [vmem:[%s1214_s30 + $0x98] sm:$0xff] %v791_v32  ;;  %805 = vst [vmem:[%s1214_s30 + $0x8] sm:$0xff] %v773_v33 }
  0xed   : > { %821 = vst [vmem:[%s1214_s30 + $0x88] sm:$0xff] %v789_v35 }
  0xee   : > { %v1023_v36 = vpop.f32.mrb[4].mxu0 }
  0xef   : > { %v778_v37 = vadd.f32 %v1023_v36, %v1209_v19  ;;  %v1039_v38 = vpop.f32.mrb[4].mxu1  ;;  %v555_v39 = vpop.f32.mrb[5].mxu0 }
  0xf0   : > { %v794_v40 = vadd.f32 %v1039_v38, %v1209_v19  ;;  %v776_v41 = vadd.f32 %v1209_v19, %v555_v39  ;;  %v619_v42 = vpop.f32.mrb[5].mxu1  ;;  %v1024_v43 = vpop.f32.mrb[6].mxu0 }
  0xf1   : > { %810 = vst [vmem:[%s1214_s30 + $0x30] sm:$0xff] %v778_v37  ;;  %v792_v44 = vadd.f32 %v1209_v19, %v619_v42  ;;  %v779_v45 = vadd.f32 %v1024_v43, %v1209_v19  ;;  %v1040_v46 = vpop.f32.mrb[6].mxu1  ;;  %v558_v47 = vpop.f32.mrb[7].mxu0 }
  0xf2   : > { %826 = vst [vmem:[%s1214_s30 + $0xb0] sm:$0xff] %v794_v40  ;;  %808 = vst [vmem:[%s1214_s30 + $0x20] sm:$0xff] %v776_v41  ;;  %v795_v48 = vadd.f32 %v1040_v46, %v1209_v19  ;;  %v777_v49 = vadd.f32 %v1209_v19, %v558_v47  ;;  %v622_v50 = vpop.f32.mrb[7].mxu1 }
  0xf3   : > { %824 = vst [vmem:[%s1214_s30 + $0xa0] sm:$0xff] %v792_v44  ;;  %811 = vst [vmem:[%s1214_s30 + $0x38] sm:$0xff] %v779_v45  ;;  %v793_v51 = vadd.f32 %v1209_v19, %v622_v50 }
  0xf4   : > { %827 = vst [vmem:[%s1214_s30 + $0xb8] sm:$0xff] %v795_v48  ;;  %809 = vst [vmem:[%s1214_s30 + $0x28] sm:$0xff] %v777_v49 }
  0xf5   : > { %825 = vst [vmem:[%s1214_s30 + $0xa8] sm:$0xff] %v793_v51 }
  0xf6   : > { %v1027_v52 = vpop.f32.mrb[8].mxu0 }
  0xf7   : > { %v782_v53 = vadd.f32 %v1027_v52, %v1209_v19  ;;  %v1043_v54 = vpop.f32.mrb[8].mxu1  ;;  %v571_v55 = vpop.f32.mrb[9].mxu0 }
  0xf8   : > { %v798_v56 = vadd.f32 %v1043_v54, %v1209_v19  ;;  %v780_v57 = vadd.f32 %v1209_v19, %v571_v55  ;;  %v635_v58 = vpop.f32.mrb[9].mxu1  ;;  %v1028_v59 = vpop.f32.mrb[10].mxu0 }
  0xf9   : > { %814 = vst [vmem:[%s1214_s30 + $0x50] sm:$0xff] %v782_v53  ;;  %v796_v60 = vadd.f32 %v1209_v19, %v635_v58  ;;  %v783_v61 = vadd.f32 %v1028_v59, %v1209_v19  ;;  %v1044_v62 = vpop.f32.mrb[10].mxu1  ;;  %v574_v63 = vpop.f32.mrb[11].mxu0 }
  0xfa   : > { %830 = vst [vmem:[%s1214_s30 + $0xd0] sm:$0xff] %v798_v56  ;;  %812 = vst [vmem:[%s1214_s30 + $0x40] sm:$0xff] %v780_v57  ;;  %v799_v0 = vadd.f32 %v1044_v62, %v1209_v19  ;;  %v781_v1 = vadd.f32 %v1209_v19, %v574_v63  ;;  %v638_v2 = vpop.f32.mrb[11].mxu1 }
  0xfb   : > { %828 = vst [vmem:[%s1214_s30 + $0xc0] sm:$0xff] %v796_v60  ;;  %815 = vst [vmem:[%s1214_s30 + $0x58] sm:$0xff] %v783_v61  ;;  %v797_v3 = vadd.f32 %v1209_v19, %v638_v2 }
  0xfc   : > { %831 = vst [vmem:[%s1214_s30 + $0xd8] sm:$0xff] %v799_v0  ;;  %813 = vst [vmem:[%s1214_s30 + $0x48] sm:$0xff] %v781_v1 }
  0xfd   : > { %829 = vst [vmem:[%s1214_s30 + $0xc8] sm:$0xff] %v797_v3 }
  0xfe   : > { %v1031_v4 = vpop.f32.mrb[12].mxu0 }
  0xff   : > { %v786_v5 = vadd.f32 %v1031_v4, %v1209_v19  ;;  %v1047_v6 = vpop.f32.mrb[12].mxu1  ;;  %v587_v7 = vpop.f32.mrb[13].mxu0 }
 0x100   : > { %v802_v8 = vadd.f32 %v1047_v6, %v1209_v19  ;;  %v784_v9 = vadd.f32 %v1209_v19, %v587_v7  ;;  %v651_v10 = vpop.f32.mrb[13].mxu1  ;;  %v1032_v11 = vpop.f32.mrb[14].mxu0 }
 0x101   : > { %818 = vst [vmem:[%s1214_s30 + $0x70] sm:$0xff] %v786_v5  ;;  %v800_v12 = vadd.f32 %v1209_v19, %v651_v10  ;;  %v787_v13 = vadd.f32 %v1032_v11, %v1209_v19  ;;  %v1048_v14 = vpop.f32.mrb[14].mxu1  ;;  %v590_v15 = vpop.f32.mrb[15].mxu0 }
 0x102   : > { %834 = vst [vmem:[%s1214_s30 + $0xf0] sm:$0xff] %v802_v8  ;;  %816 = vst [vmem:[%s1214_s30 + $0x60] sm:$0xff] %v784_v9  ;;  %v803_v16 = vadd.f32 %v1048_v14, %v1209_v19  ;;  %v785_v17 = vadd.f32 %v1209_v19, %v590_v15  ;;  %v654_v18 = vpop.f32.mrb[15].mxu1 }
 0x103   : > { %832 = vst [vmem:[%s1214_s30 + $0xe0] sm:$0xff] %v800_v12  ;;  %819 = vst [vmem:[%s1214_s30 + $0x78] sm:$0xff] %v787_v13  ;;  %v801_v20 = vadd.f32 %v1209_v19, %v654_v18 }
 0x104   : > { %835 = vst [vmem:[%s1214_s30 + $0xf8] sm:$0xff] %v803_v16  ;;  %817 = vst [vmem:[%s1214_s30 + $0x68] sm:$0xff] %v785_v17 }
 0x105   : > { %833 = vst [vmem:[%s1214_s30 + $0xe8] sm:$0xff] %v801_v20 }
 0x106 PF: > { %s13_s14 = sadd.s32 1, %s1119_s14   ;;  %s1293_s12 = smov %s1115_s13 }
 0x107   : > { %p10_p5 = scmp.ge.s32.totalorder %s13_s14, 4   ;;  %s1294_s13 = smov %s1296_s15 }
 0x109   :  { %12 = sbr.rel (!%p10_p5) target bundleno = 2 (0x2), region = 76 }

// kernel: _resolution_forward.11
= control target key start
LH: loop header
LB: loop body
LE: loop exit
PB: predicated region body
PF: predicated region fallthrough
CT: control target
= control target key end

     0   :  { %s1156_s12 = smov 0   ;;  %s1158_s13 = smov 0   ;;  %s1307_s0 = inlined_call_operand.vmem [shape: bf16[512,36], index: 0, kind: input, shape index: {}]   ;;  %s1308_s1 = inlined_call_operand.vmem [shape: bf16[36,128], index: 1, kind: input, shape index: {}]   ;;  %s1309_s2 = inlined_call_operand.vmem [shape: f32[1,128], index: 2, kind: input, shape index: {}]   ;;  %s1310_s3 = inlined_call_operand.vmem [shape: f32[512,128], index: 3, kind: output, shape index: {}]  }
   0x1   :  { %s1160_s14 = smov 0  }
   0x2 LB: > { %s32_s15 = sadd.s32 1, %s1130_s13  ;;  %p961_p0 = scmp.ge.s32.totalorder %s1134_s14, 1  ;;  %s1134_s14 = sphi %s1160_s14, %s13_s14   ;;  %s1130_s13 = sphi %s1158_s13, %s1312_s13   ;;  %s1126_s12 = sphi %s1156_s12, %s1311_s12  }
   0x3   : > { %p34_p1 = scmp.ge.s32.totalorder %s32_s15, 2  ;;  %p188_p2 = scmp.lt.s32.totalorder %s1134_s14, 3 }
   0x5   : > { %s1314_s15 = smov (%p34_p1, %s32_s15), 0  ;;  %p189_p3 = pnand %p961_p0, %p188_p2 }
   0x6   : > { %v1093_v0 = vld [vmem:[%s1308_s1] sm:$0xff] (!%p189_p3)   ;;  %v1094_v1 = vld [vmem:[%s1308_s1 + $0x8] sm:$0xff] (!%p189_p3)   ;;  %s962_s20 = sshll.u32 (!%p189_p3), %s1126_s12, 5  ;;  %v1095_v2 = vld [vmem:[%s1308_s1 + $0x10] ss:$0 sps:$4 sm:$0x33] (!%p189_p3)  }
   0x7   : > { %192 = sbr.rel (%p189_p3) target bundleno = 262 (0x106), region = 32  ;;  %1023 = vmatprep.subr.bf16.mxu0 (!%p189_p3), %v1093_v0  ;;  %1061 = vmatprep.subr.bf16.mxu1 (!%p189_p3), %v1093_v0  ;;  %p230_p4 = scmp.lt.s32.totalorder (!%p189_p3), %s962_s20, 63  ;;  %vm509_vm0 = vcmask (!%p189_p3), 1041408   ;;  %vm460_vm1 = vcmask (!%p189_p3), 293888   ;;  %v1227_v20 = vld [vmem:[%s1309_s2] ss:$0 sm:$0xff] (!%p189_p3) }
   0x8   : > { %1024 = vmatpush3.bf16.msra.mxu0 (!%p189_p3), %v1093_v0  ;;  %1064 = vmatpush3.bf16.msra.mxu1 (!%p189_p3), %v1093_v0  ;;  %v511_v3 = vsel (!%p189_p3), %vm509_vm0, %v1095_v2, 0 }
   0x9   : > { %1025 = vmatprep.subr.bf16.mxu0 (!%p189_p3), %v1094_v1  ;;  %1062 = vmatprep.subr.bf16.mxu1 (!%p189_p3), %v1094_v1 }
   0xc   : > { %1026 = vmatpush3.bf16.msra.mxu0 (!%p189_p3), %v1094_v1  ;;  %1065 = vmatpush3.bf16.msra.mxu1 (!%p189_p3), %v1094_v1 }
   0xd   : > { %1067 = vmatprep.subr.msk.bf16.mxu0 (!%p189_p3), %vm509_vm0, %v1095_v2  ;;  %1068 = vmatprep.subr.msk.bf16.mxu1 (!%p189_p3), %vm509_vm0, %v1095_v2 }
   0xe   : > { %s1316_s20 = smov (!%p230_p4, %s962_s20), 63 }
   0xf   : > { %s963_s23 = sshll.u32 %s1316_s20, 2  ;;  %s965_s27 = sshll.u32 %s1316_s20, 3 }
  0x10   : > { %s1189_s26 = scalar_lea.vmem %s1307_s0, %s963_s23  ;;  %1028 = vmatpush3.bf16.msra.mxu0 %v511_v3  ;;  %1066 = vmatpush3.bf16.msra.mxu1 %v511_v3  ;;  %s1232_s5 = scalar_lea.vmem %s1310_s3, %s965_s27 }
  0x11   : > { %v1096_v4 = vld [vmem:[%s1189_s26] sm:$0xff]   ;;  %v1098_v6 = vld [vmem:[%s1189_s26 + $0x8] sm:$0xff]   ;;  %v1100_v8 = vld [vmem:[%s1189_s26 + $0x10] sm:$0xff]  }
  0x12   : > { %v1097_v5 = vld [vmem:[%s1189_s26 + $0x40] sm:$0xff]   ;;  %1029 = vmatprep.mubr.msk.bf16.mxu0 %vm460_vm1, %v1096_v4  ;;  %v1099_v7 = vld [vmem:[%s1189_s26 + $0x48] sm:$0xff]   ;;  %v1101_v9 = vld [vmem:[%s1189_s26 + $0x50] sm:$0xff]  }
  0x13   : > { %1045 = vmatprep.mubr.msk.bf16.mxu1 %vm460_vm1, %v1097_v5  ;;  %1030 = vmatmul.mubr.msk.bf16.vlgmr.msra.gmra.mrb[0].mxu0 %vm460_vm1, %v1098_v6  ;;  %v1102_v10 = vld [vmem:[%s1189_s26 + $0x18] sm:$0xff]   ;;  %v1104_v12 = vld [vmem:[%s1189_s26 + $0x20] sm:$0xff]   ;;  %v1106_v14 = vld [vmem:[%s1189_s26 + $0x28] sm:$0xff]  }
  0x14   : > { %1046 = vmatmul.mubr.msk.bf16.vlgmr.msra.gmra.mrb[0].mxu1 %vm460_vm1, %v1099_v7  ;;  %1033 = vmatprep.mubr.msk.bf16.mxu0 %vm460_vm1, %v1100_v8  ;;  %v1103_v11 = vld [vmem:[%s1189_s26 + $0x58] sm:$0xff]   ;;  %v1105_v13 = vld [vmem:[%s1189_s26 + $0x60] sm:$0xff]   ;;  %v1107_v15 = vld [vmem:[%s1189_s26 + $0x68] sm:$0xff]  }
  0x15   : > { %1049 = vmatprep.mubr.msk.bf16.mxu1 %vm460_vm1, %v1101_v9  ;;  %v1108_v16 = vld [vmem:[%s1189_s26 + $0x30] sm:$0xff]   ;;  %v1110_v18 = vld [vmem:[%s1189_s26 + $0x38] sm:$0xff]  }
  0x16   : > { %v1109_v17 = vld [vmem:[%s1189_s26 + $0x70] sm:$0xff]   ;;  %v1111_v19 = vld [vmem:[%s1189_s26 + $0x78] sm:$0xff]  }
  0x1b   : > { %1034 = vmatmul.mubr.msk.bf16.gmra.mrb[4].mxu0 %vm460_vm1, %v1102_v10 }
  0x1c   : > { %1050 = vmatmul.mubr.msk.bf16.gmra.mrb[4].mxu1 %vm460_vm1, %v1103_v11  ;;  %1037 = vmatprep.mubr.msk.bf16.mxu0 %vm460_vm1, %v1104_v12 }
  0x1d   : > { %1053 = vmatprep.mubr.msk.bf16.mxu1 %vm460_vm1, %v1105_v13 }
  0x23   : > { %1038 = vmatmul.mubr.msk.bf16.gmra.mrb[8].mxu0 %vm460_vm1, %v1106_v14 }
  0x24   : > { %1054 = vmatmul.mubr.msk.bf16.gmra.mrb[8].mxu1 %vm460_vm1, %v1107_v15  ;;  %1041 = vmatprep.mubr.msk.bf16.mxu0 %vm460_vm1, %v1108_v16 }
  0x25   : > { %1057 = vmatprep.mubr.msk.bf16.mxu1 %vm460_vm1, %v1109_v17 }
  0x2b   : > { %1042 = vmatmul.mubr.msk.bf16.gmra.mrb[12].mxu0 %vm460_vm1, %v1110_v18 }
  0x2c   : > { %1058 = vmatmul.mubr.msk.bf16.gmra.mrb[12].mxu1 %vm460_vm1, %v1111_v19 }
  0xe6   : > { %v1031_v21 = vpop.f32.mrb[0].mxu0 }
  0xe7   : > { %v1047_v22 = vpop.f32.mrb[0].mxu1  ;;  %v782_v23 = vadd.f32 %v1031_v21, %v1227_v20  ;;  %v547_v25 = vpop.f32.mrb[1].mxu0 }
  0xe8   : > { %v798_v24 = vadd.f32 %v1047_v22, %v1227_v20  ;;  %v611_v26 = vpop.f32.mrb[1].mxu1  ;;  %v780_v27 = vadd.f32 %v1227_v20, %v547_v25  ;;  %v1032_v29 = vpop.f32.mrb[2].mxu0 }
  0xe9   : > { %v796_v28 = vadd.f32 %v1227_v20, %v611_v26  ;;  %v1048_v30 = vpop.f32.mrb[2].mxu1  ;;  %814 = vst [vmem:[%s1232_s5 + $0x10] sm:$0xff] %v782_v23  ;;  %v783_v31 = vadd.f32 %v1032_v29, %v1227_v20  ;;  %v550_v33 = vpop.f32.mrb[3].mxu0 }
  0xea   : > { %830 = vst [vmem:[%s1232_s5 + $0x90] sm:$0xff] %v798_v24  ;;  %v799_v32 = vadd.f32 %v1048_v30, %v1227_v20  ;;  %v614_v34 = vpop.f32.mrb[3].mxu1  ;;  %812 = vst [vmem:[%s1232_s5] sm:$0xff] %v780_v27  ;;  %v781_v35 = vadd.f32 %v1227_v20, %v550_v33 }
  0xeb   : > { %828 = vst [vmem:[%s1232_s5 + $0x80] sm:$0xff] %v796_v28  ;;  %v797_v36 = vadd.f32 %v1227_v20, %v614_v34  ;;  %815 = vst [vmem:[%s1232_s5 + $0x18] sm:$0xff] %v783_v31 }
  0xec   : > { %831 = vst [vmem:[%s1232_s5 + $0x98] sm:$0xff] %v799_v32  ;;  %813 = vst [vmem:[%s1232_s5 + $0x8] sm:$0xff] %v781_v35 }
  0xed   : > { %829 = vst [vmem:[%s1232_s5 + $0x88] sm:$0xff] %v797_v36 }
  0xee   : > { %v1035_v37 = vpop.f32.mrb[4].mxu0 }
  0xef   : > { %v1051_v38 = vpop.f32.mrb[4].mxu1  ;;  %v786_v39 = vadd.f32 %v1035_v37, %v1227_v20  ;;  %v563_v41 = vpop.f32.mrb[5].mxu0 }
  0xf0   : > { %v802_v40 = vadd.f32 %v1051_v38, %v1227_v20  ;;  %v627_v42 = vpop.f32.mrb[5].mxu1  ;;  %v784_v43 = vadd.f32 %v1227_v20, %v563_v41  ;;  %v1036_v45 = vpop.f32.mrb[6].mxu0 }
  0xf1   : > { %v800_v44 = vadd.f32 %v1227_v20, %v627_v42  ;;  %v1052_v46 = vpop.f32.mrb[6].mxu1  ;;  %818 = vst [vmem:[%s1232_s5 + $0x30] sm:$0xff] %v786_v39  ;;  %v787_v47 = vadd.f32 %v1036_v45, %v1227_v20  ;;  %v566_v49 = vpop.f32.mrb[7].mxu0 }
  0xf2   : > { %834 = vst [vmem:[%s1232_s5 + $0xb0] sm:$0xff] %v802_v40  ;;  %v803_v48 = vadd.f32 %v1052_v46, %v1227_v20  ;;  %v630_v50 = vpop.f32.mrb[7].mxu1  ;;  %816 = vst [vmem:[%s1232_s5 + $0x20] sm:$0xff] %v784_v43  ;;  %v785_v51 = vadd.f32 %v1227_v20, %v566_v49 }
  0xf3   : > { %832 = vst [vmem:[%s1232_s5 + $0xa0] sm:$0xff] %v800_v44  ;;  %v801_v52 = vadd.f32 %v1227_v20, %v630_v50  ;;  %819 = vst [vmem:[%s1232_s5 + $0x38] sm:$0xff] %v787_v47 }
  0xf4   : > { %835 = vst [vmem:[%s1232_s5 + $0xb8] sm:$0xff] %v803_v48  ;;  %817 = vst [vmem:[%s1232_s5 + $0x28] sm:$0xff] %v785_v51 }
  0xf5   : > { %833 = vst [vmem:[%s1232_s5 + $0xa8] sm:$0xff] %v801_v52 }
  0xf6   : > { %v1039_v53 = vpop.f32.mrb[8].mxu0 }
  0xf7   : > { %v1055_v54 = vpop.f32.mrb[8].mxu1  ;;  %v790_v55 = vadd.f32 %v1039_v53, %v1227_v20  ;;  %v579_v57 = vpop.f32.mrb[9].mxu0 }
  0xf8   : > { %v806_v56 = vadd.f32 %v1055_v54, %v1227_v20  ;;  %v643_v58 = vpop.f32.mrb[9].mxu1  ;;  %v788_v59 = vadd.f32 %v1227_v20, %v579_v57  ;;  %v1040_v61 = vpop.f32.mrb[10].mxu0 }
  0xf9   : > { %v804_v60 = vadd.f32 %v1227_v20, %v643_v58  ;;  %v1056_v62 = vpop.f32.mrb[10].mxu1  ;;  %822 = vst [vmem:[%s1232_s5 + $0x50] sm:$0xff] %v790_v55  ;;  %v791_v63 = vadd.f32 %v1040_v61, %v1227_v20  ;;  %v582_v1 = vpop.f32.mrb[11].mxu0 }
  0xfa   : > { %838 = vst [vmem:[%s1232_s5 + $0xd0] sm:$0xff] %v806_v56  ;;  %v807_v0 = vadd.f32 %v1056_v62, %v1227_v20  ;;  %v646_v2 = vpop.f32.mrb[11].mxu1  ;;  %820 = vst [vmem:[%s1232_s5 + $0x40] sm:$0xff] %v788_v59  ;;  %v789_v3 = vadd.f32 %v1227_v20, %v582_v1 }
  0xfb   : > { %836 = vst [vmem:[%s1232_s5 + $0xc0] sm:$0xff] %v804_v60  ;;  %v805_v4 = vadd.f32 %v1227_v20, %v646_v2  ;;  %823 = vst [vmem:[%s1232_s5 + $0x58] sm:$0xff] %v791_v63 }
  0xfc   : > { %839 = vst [vmem:[%s1232_s5 + $0xd8] sm:$0xff] %v807_v0  ;;  %821 = vst [vmem:[%s1232_s5 + $0x48] sm:$0xff] %v789_v3 }
  0xfd   : > { %837 = vst [vmem:[%s1232_s5 + $0xc8] sm:$0xff] %v805_v4 }
  0xfe   : > { %v1043_v5 = vpop.f32.mrb[12].mxu0 }
  0xff   : > { %v1059_v6 = vpop.f32.mrb[12].mxu1  ;;  %v794_v7 = vadd.f32 %v1043_v5, %v1227_v20  ;;  %v595_v9 = vpop.f32.mrb[13].mxu0 }
 0x100   : > { %v810_v8 = vadd.f32 %v1059_v6, %v1227_v20  ;;  %v659_v10 = vpop.f32.mrb[13].mxu1  ;;  %v792_v11 = vadd.f32 %v1227_v20, %v595_v9  ;;  %v1044_v13 = vpop.f32.mrb[14].mxu0 }
 0x101   : > { %v808_v12 = vadd.f32 %v1227_v20, %v659_v10  ;;  %v1060_v14 = vpop.f32.mrb[14].mxu1  ;;  %826 = vst [vmem:[%s1232_s5 + $0x70] sm:$0xff] %v794_v7  ;;  %v795_v15 = vadd.f32 %v1044_v13, %v1227_v20  ;;  %v598_v17 = vpop.f32.mrb[15].mxu0 }
 0x102   : > { %842 = vst [vmem:[%s1232_s5 + $0xf0] sm:$0xff] %v810_v8  ;;  %v811_v16 = vadd.f32 %v1060_v14, %v1227_v20  ;;  %v662_v18 = vpop.f32.mrb[15].mxu1  ;;  %824 = vst [vmem:[%s1232_s5 + $0x60] sm:$0xff] %v792_v11  ;;  %v793_v19 = vadd.f32 %v1227_v20, %v598_v17 }
 0x103   : > { %840 = vst [vmem:[%s1232_s5 + $0xe0] sm:$0xff] %v808_v12  ;;  %v809_v21 = vadd.f32 %v1227_v20, %v662_v18  ;;  %827 = vst [vmem:[%s1232_s5 + $0x78] sm:$0xff] %v795_v15 }
 0x104   : > { %843 = vst [vmem:[%s1232_s5 + $0xf8] sm:$0xff] %v811_v16  ;;  %825 = vst [vmem:[%s1232_s5 + $0x68] sm:$0xff] %v793_v19 }
 0x105   : > { %841 = vst [vmem:[%s1232_s5 + $0xe8] sm:$0xff] %v809_v21 }
 0x106 PF: > { %s13_s14 = sadd.s32 1, %s1134_s14   ;;  %s1311_s12 = smov %s1130_s13 }
 0x107   : > { %p10_p5 = scmp.ge.s32.totalorder %s13_s14, 4   ;;  %s1312_s13 = smov %s1314_s15 }
 0x109   :  { %12 = sbr.rel (!%p10_p5) target bundleno = 2 (0x2), region = 76 }

// kernel: _resolution_forward.12
= control target key start
LH: loop header
LB: loop body
LE: loop exit
PB: predicated region body
PF: predicated region fallthrough
CT: control target
= control target key end

     0   :  { %vm121_vm0 = vcmask 588800   ;;  %vm140_vm1 = vcmask 1043456   ;;  %s471_s1 = inlined_call_operand.vmem [shape: bf16[72,128], index: 1, kind: input, shape index: {}]   ;;  %s472_s0 = inlined_call_operand.vmem [shape: bf16[96,72], index: 0, kind: input, shape index: {}]   ;;  %s473_s2 = inlined_call_operand.vmem [shape: f32[1,128], index: 2, kind: input, shape index: {}]   ;;  %s474_s3 = inlined_call_operand.vmem [shape: f32[96,128], index: 3, kind: output, shape index: {}]  }
   0x1   :  { %v362_v0 = vld [vmem:[%s471_s1] sm:$0xff]   ;;  %v363_v1 = vld [vmem:[%s471_s1 + $0x8] sm:$0xff]   ;;  %v364_v2 = vld [vmem:[%s471_s1 + $0x10] sm:$0xff]  }
   0x2   :  { %350 = vmatprep.subr.bf16.mxu1 %v362_v0  ;;  %328 = vmatprep.subr.bf16.mxu0 %v362_v0  ;;  %v367_v3 = vld [vmem:[%s472_s0 + $0x10] sm:$0xff]   ;;  %v369_v4 = vld [vmem:[%s472_s0] sm:$0xff]   ;;  %v365_v5 = vld [vmem:[%s471_s1 + $0x18] sm:$0xff]  }
   0x3   :  { %355 = vmatpush3.bf16.msra.mxu1 %v362_v0  ;;  %329 = vmatpush3.bf16.msra.mxu0 %v362_v0  ;;  %v366_v6 = vld [vmem:[%s471_s1 + $0x20] ss:$0 sps:$4 sm:$0xff]   ;;  %v368_v8 = vld [vmem:[%s472_s0 + $0x18] sm:$0xff]   ;;  %v370_v9 = vld [vmem:[%s472_s0 + $0x8] sm:$0xff]  }
   0x4   :  { %351 = vmatprep.subr.bf16.mxu1 %v363_v1  ;;  %330 = vmatprep.subr.bf16.mxu0 %v363_v1  ;;  %v142_v7 = vsel %vm140_vm1, %v366_v6, 0  ;;  %v371_v10 = vld [vmem:[%s472_s0 + $0x20] sm:$0xff]   ;;  %v372_v11 = vld [vmem:[%s472_s0 + $0x28] sm:$0xff]  }
   0x5   :  { %342 = vmatprep.mubr.msk.bf16.mxu1 %vm121_vm0, %v367_v3  ;;  %338 = vmatprep.mubr.msk.bf16.mxu0 %vm121_vm0, %v369_v4  ;;  %v316_v12 = vld [vmem:[%s473_s2] ss:$0 sm:$0xff] }
   0x7   :  { %356 = vmatpush3.bf16.msra.mxu1 %v363_v1  ;;  %331 = vmatpush3.bf16.msra.mxu0 %v363_v1 }
   0x8   :  { %352 = vmatprep.subr.bf16.mxu1 %v364_v2  ;;  %332 = vmatprep.subr.bf16.mxu0 %v364_v2 }
   0xb   :  { %357 = vmatpush3.bf16.msra.mxu1 %v364_v2  ;;  %333 = vmatpush3.bf16.msra.mxu0 %v364_v2 }
   0xc   :  { %353 = vmatprep.subr.bf16.mxu1 %v365_v5  ;;  %334 = vmatprep.subr.bf16.mxu0 %v365_v5 }
   0xf   :  { %358 = vmatpush3.bf16.msra.mxu1 %v365_v5  ;;  %335 = vmatpush3.bf16.msra.mxu0 %v365_v5 }
  0x10   :  { %361 = vmatprep.subr.msk.bf16.mxu1 %vm140_vm1, %v366_v6  ;;  %360 = vmatprep.subr.msk.bf16.mxu0 %vm140_vm1, %v366_v6 }
  0x13   :  { %359 = vmatpush3.bf16.msra.mxu1 %v142_v7  ;;  %337 = vmatpush3.bf16.msra.mxu0 %v142_v7 }
  0x16   :  { %343 = vmatmul.mubr.msk.bf16.vlgmr.msra.gmra.mrb[0].mxu1 %vm121_vm0, %v368_v8  ;;  %339 = vmatmul.mubr.msk.bf16.vlgmr.msra.gmra.mrb[0].mxu0 %vm121_vm0, %v370_v9 }
  0x17   :  { %346 = vmatprep.mubr.msk.bf16.mxu1 %vm121_vm0, %v371_v10 }
  0x1e   :  { %347 = vmatmul.mubr.msk.bf16.gmra.mrb[4].mxu1 %vm121_vm0, %v372_v11 }
  0xe9   :  { %v344_v13 = vpop.f32.mrb[0].mxu1  ;;  %v340_v14 = vpop.f32.mrb[0].mxu0 }
  0xea   :  { %v277_v15 = vadd.f32 %v344_v13, %v316_v12  ;;  %v194_v16 = vpop.f32.mrb[1].mxu1  ;;  %v273_v17 = vadd.f32 %v340_v14, %v316_v12  ;;  %v178_v18 = vpop.f32.mrb[1].mxu0 }
  0xeb   :  { %v275_v19 = vadd.f32 %v316_v12, %v194_v16  ;;  %v345_v20 = vpop.f32.mrb[2].mxu1  ;;  %v271_v21 = vadd.f32 %v316_v12, %v178_v18  ;;  %v341_v22 = vpop.f32.mrb[2].mxu0 }
  0xec   :  { %289 = vst [vmem:[%s474_s3 + $0x30] sm:$0xff] %v277_v15  ;;  %v278_v23 = vadd.f32 %v345_v20, %v316_v12  ;;  %v197_v24 = vpop.f32.mrb[3].mxu1  ;;  %285 = vst [vmem:[%s474_s3 + $0x10] sm:$0xff] %v273_v17  ;;  %v274_v25 = vadd.f32 %v341_v22, %v316_v12  ;;  %v181_v26 = vpop.f32.mrb[3].mxu0 }
  0xed   :  { %287 = vst [vmem:[%s474_s3 + $0x20] sm:$0xff] %v275_v19  ;;  %v276_v27 = vadd.f32 %v316_v12, %v197_v24  ;;  %283 = vst [vmem:[%s474_s3] sm:$0xff] %v271_v21  ;;  %v272_v28 = vadd.f32 %v316_v12, %v181_v26 }
  0xee   :  { %290 = vst [vmem:[%s474_s3 + $0x38] sm:$0xff] %v278_v23  ;;  %286 = vst [vmem:[%s474_s3 + $0x18] sm:$0xff] %v274_v25 }
  0xef   :  { %288 = vst [vmem:[%s474_s3 + $0x28] sm:$0xff] %v276_v27  ;;  %284 = vst [vmem:[%s474_s3 + $0x8] sm:$0xff] %v272_v28 }
  0xf1   :  { %v348_v29 = vpop.f32.mrb[4].mxu1 }
  0xf2   :  { %v281_v30 = vadd.f32 %v348_v29, %v316_v12  ;;  %v210_v31 = vpop.f32.mrb[5].mxu1 }
  0xf3   :  { %v279_v32 = vadd.f32 %v316_v12, %v210_v31  ;;  %v349_v33 = vpop.f32.mrb[6].mxu1 }
  0xf4   :  { %293 = vst [vmem:[%s474_s3 + $0x50] sm:$0xff] %v281_v30  ;;  %v282_v34 = vadd.f32 %v349_v33, %v316_v12  ;;  %v213_v35 = vpop.f32.mrb[7].mxu1 }
  0xf5   :  { %291 = vst [vmem:[%s474_s3 + $0x40] sm:$0xff] %v279_v32  ;;  %v280_v36 = vadd.f32 %v316_v12, %v213_v35 }
  0xf6   :  { %294 = vst [vmem:[%s474_s3 + $0x58] sm:$0xff] %v282_v34 }
  0xf7   :  { %292 = vst [vmem:[%s474_s3 + $0x48] sm:$0xff] %v280_v36 }

// kernel: _resolution_forward.13
= control target key start
LH: loop header
LB: loop body
LE: loop exit
PB: predicated region body
PF: predicated region fallthrough
CT: control target
= control target key end

     0   :  { %v429_v0 = vmov 0   ;;  %vm181_vm0 = vcmask 130048   ;;  %s558_s1 = inlined_call_operand.vmem [shape: bf16[144,128], index: 1, kind: input, shape index: {}]   ;;  %s559_s0 = inlined_call_operand.vmem [shape: bf16[96,144], index: 0, kind: input, shape index: {}]   ;;  %s560_s2 = inlined_call_operand.vmem [shape: f32[1,128], index: 2, kind: input, shape index: {}]   ;;  %s561_s3 = inlined_call_operand.vmem [shape: f32[96,128], index: 3, kind: output, shape index: {}]  }
   0x1   :  { %200 = vmatprep.subr.bf16.mxu0 %v429_v0  ;;  %383 = vmatprep.subr.bf16.mxu1 %v429_v0  ;;  %v402_v1 = vld [vmem:[%s558_s1] sm:$0xff]   ;;  %v403_v2 = vld [vmem:[%s558_s1 + $0x8] sm:$0xff]   ;;  %v404_v3 = vld [vmem:[%s558_s1 + $0x10] sm:$0xff]  }
   0x2   :  { %201 = vmatpush1.bf16.msra.mxu0 %v402_v1  ;;  %392 = vmatpush1.bf16.msra.mxu1 %v402_v1  ;;  %v405_v4 = vld [vmem:[%s558_s1 + $0x18] sm:$0xff]   ;;  %v413_v5 = vld [vmem:[%s559_s0 + $0x4] ss:$8 sps:$4 sm:$0xff]   ;;  %v408_v9 = vld [vmem:[%s558_s1 + $0x30] sm:$0xff]  }
   0x3   :  { %202 = vmatprep.subr.bf16.mxu0 %v429_v0  ;;  %384 = vmatprep.subr.bf16.mxu1 %v429_v0  ;;  %v416_v6 = vld [vmem:[%s559_s0 + $0x34] ss:$8 sps:$4 sm:$0xff]   ;;  %v406_v7 = vld [vmem:[%s558_s1 + $0x20] sm:$0xff]   ;;  %v407_v8 = vld [vmem:[%s558_s1 + $0x28] sm:$0xff]  }
   0x4   :  { %376 = vmatprep.mubr.msk.bf16.mxu0 %vm181_vm0, %v413_v5  ;;  %379 = vmatprep.mubr.msk.bf16.mxu1 %vm181_vm0, %v416_v6  ;;  %v409_v10 = vld [vmem:[%s558_s1 + $0x38] sm:$0xff]   ;;  %v410_v11 = vld [vmem:[%s558_s1 + $0x40] sm:$0xff]  }
   0x5   :  { %v411_v12 = vld [vmem:[%s559_s0] ss:$8 sps:$4 sm:$0xff]   ;;  %v414_v13 = vld [vmem:[%s559_s0 + $0x30] ss:$8 sps:$4 sm:$0xff]   ;;  %v417_v14 = vld [vmem:[%s559_s0 + $0x14] ss:$8 sps:$4 sm:$0xff]  }
   0x6   :  { %203 = vmatpush1.bf16.msra.mxu0 %v403_v2  ;;  %393 = vmatpush1.bf16.msra.mxu1 %v403_v2  ;;  %v419_v15 = vld [vmem:[%s559_s0 + $0x44] ss:$8 sps:$4 sm:$0xff]   ;;  %v421_v16 = vld [vmem:[%s559_s0 + $0x10] ss:$8 sps:$4 sm:$0xff]   ;;  %v422_v17 = vld [vmem:[%s559_s0 + $0x40] ss:$8 sps:$4 sm:$0xff]  }
   0x7   :  { %204 = vmatprep.subr.bf16.mxu0 %v429_v0  ;;  %385 = vmatprep.subr.bf16.mxu1 %v429_v0  ;;  %v423_v18 = vld [vmem:[%s559_s0 + $0x24] ss:$8 sps:$4 sm:$0xff]   ;;  %v425_v19 = vld [vmem:[%s559_s0 + $0x54] ss:$8 sps:$4 sm:$0xff]   ;;  %v427_v20 = vld [vmem:[%s559_s0 + $0x20] ss:$8 sps:$4 sm:$0xff]  }
   0x8   :  { %v428_v21 = vld [vmem:[%s559_s0 + $0x50] ss:$8 sps:$4 sm:$0xff]   ;;  %v382_v22 = vld [vmem:[%s560_s2] ss:$0 sm:$0xff] }
   0xa   :  { %205 = vmatpush1.bf16.msra.mxu0 %v404_v3  ;;  %394 = vmatpush1.bf16.msra.mxu1 %v404_v3 }
   0xb   :  { %206 = vmatprep.subr.bf16.mxu0 %v429_v0  ;;  %386 = vmatprep.subr.bf16.mxu1 %v429_v0 }
   0xe   :  { %207 = vmatpush1.bf16.msra.mxu0 %v405_v4  ;;  %395 = vmatpush1.bf16.msra.mxu1 %v405_v4 }
   0xf   :  { %208 = vmatprep.subr.bf16.mxu0 %v429_v0  ;;  %387 = vmatprep.subr.bf16.mxu1 %v429_v0 }
  0x12   :  { %209 = vmatpush1.bf16.msra.mxu0 %v406_v7  ;;  %396 = vmatpush1.bf16.msra.mxu1 %v406_v7 }
  0x13   :  { %210 = vmatprep.subr.bf16.mxu0 %v429_v0  ;;  %388 = vmatprep.subr.bf16.mxu1 %v429_v0 }
  0x16   :  { %211 = vmatpush1.bf16.msra.mxu0 %v407_v8  ;;  %397 = vmatpush1.bf16.msra.mxu1 %v407_v8 }
  0x17   :  { %212 = vmatprep.subr.bf16.mxu0 %v429_v0  ;;  %389 = vmatprep.subr.bf16.mxu1 %v429_v0 }
  0x1a   :  { %213 = vmatpush1.bf16.msra.mxu0 %v408_v9  ;;  %398 = vmatpush1.bf16.msra.mxu1 %v408_v9 }
  0x1b   :  { %214 = vmatprep.subr.bf16.mxu0 %v429_v0  ;;  %390 = vmatprep.subr.bf16.mxu1 %v429_v0 }
  0x1e   :  { %215 = vmatpush1.bf16.msra.mxu0 %v409_v10  ;;  %399 = vmatpush1.bf16.msra.mxu1 %v409_v10 }
  0x1f   :  { %216 = vmatprep.subr.bf16.mxu0 %v429_v0  ;;  %391 = vmatprep.subr.bf16.mxu1 %v429_v0 }
  0x22   :  { %217 = vmatpush1.bf16.msra.mxu0 %v410_v11  ;;  %400 = vmatpush1.bf16.msra.mxu1 %v410_v11 }
  0x25   :  { %233 = vmatmul.mubr.bf16.vlgmr.msra.gmra.mrb[0].mxu0 %v411_v12  ;;  %257 = vmatmul.mubr.bf16.vlgmr.msra.gmra.mrb[0].mxu1 %v414_v13 }
  0x26   :  { %377 = vmatprep.mubr.msk.bf16.mxu0 %vm181_vm0, %v417_v14  ;;  %380 = vmatprep.mubr.msk.bf16.mxu1 %vm181_vm0, %v419_v15 }
  0x2d   :  { %241 = vmatmul.mubr.bf16.gmra.mrb[4].mxu0 %v421_v16  ;;  %265 = vmatmul.mubr.bf16.gmra.mrb[4].mxu1 %v422_v17 }
  0x2e   :  { %378 = vmatprep.mubr.msk.bf16.mxu0 %vm181_vm0, %v423_v18  ;;  %381 = vmatprep.mubr.msk.bf16.mxu1 %vm181_vm0, %v425_v19 }
  0x35   :  { %249 = vmatmul.mubr.bf16.gmra.mrb[8].mxu0 %v427_v20  ;;  %273 = vmatmul.mubr.bf16.gmra.mrb[8].mxu1 %v428_v21 }
  0xf8   :  { %v234_v23 = vpop.f32.mrb[0].mxu0  ;;  %v258_v24 = vpop.f32.mrb[0].mxu1 }
  0xf9   :  { %v327_v25 = vadd.f32 %v382_v22, %v234_v23  ;;  %v333_v26 = vadd.f32 %v382_v22, %v258_v24  ;;  %v236_v27 = vpop.f32.mrb[1].mxu0  ;;  %v260_v28 = vpop.f32.mrb[1].mxu1 }
  0xfa   :  { %v237_v29 = vpop.f32.mrb[2].mxu0  ;;  %v261_v30 = vpop.f32.mrb[2].mxu1 }
  0xfb   :  { %339 = vst [vmem:[%s561_s3] sm:$0xff] %v327_v25  ;;  %345 = vst [vmem:[%s561_s3 + $0x30] sm:$0xff] %v333_v26  ;;  %v328_v31 = vadd.f32 %v382_v22, %v237_v29  ;;  %v334_v32 = vadd.f32 %v382_v22, %v261_v30  ;;  %v239_v33 = vpop.f32.mrb[3].mxu0  ;;  %v263_v34 = vpop.f32.mrb[3].mxu1 }
  0xfd   :  { %340 = vst [vmem:[%s561_s3 + $0x8] sm:$0xff] %v328_v31  ;;  %346 = vst [vmem:[%s561_s3 + $0x38] sm:$0xff] %v334_v32 }
 0x100   :  { %v242_v35 = vpop.f32.mrb[4].mxu0  ;;  %v266_v36 = vpop.f32.mrb[4].mxu1 }
 0x101   :  { %v329_v37 = vadd.f32 %v382_v22, %v242_v35  ;;  %v335_v38 = vadd.f32 %v382_v22, %v266_v36  ;;  %v244_v39 = vpop.f32.mrb[5].mxu0  ;;  %v268_v40 = vpop.f32.mrb[5].mxu1 }
 0x102   :  { %v245_v41 = vpop.f32.mrb[6].mxu0  ;;  %v269_v42 = vpop.f32.mrb[6].mxu1 }
 0x103   :  { %341 = vst [vmem:[%s561_s3 + $0x10] sm:$0xff] %v329_v37  ;;  %347 = vst [vmem:[%s561_s3 + $0x40] sm:$0xff] %v335_v38  ;;  %v330_v43 = vadd.f32 %v382_v22, %v245_v41  ;;  %v336_v44 = vadd.f32 %v382_v22, %v269_v42  ;;  %v247_v45 = vpop.f32.mrb[7].mxu0  ;;  %v271_v46 = vpop.f32.mrb[7].mxu1 }
 0x105   :  { %342 = vst [vmem:[%s561_s3 + $0x18] sm:$0xff] %v330_v43  ;;  %348 = vst [vmem:[%s561_s3 + $0x48] sm:$0xff] %v336_v44 }
 0x108   :  { %v250_v47 = vpop.f32.mrb[8].mxu0  ;;  %v274_v48 = vpop.f32.mrb[8].mxu1 }
 0x109   :  { %v331_v49 = vadd.f32 %v382_v22, %v250_v47  ;;  %v337_v50 = vadd.f32 %v382_v22, %v274_v48  ;;  %v252_v51 = vpop.f32.mrb[9].mxu0  ;;  %v276_v52 = vpop.f32.mrb[9].mxu1 }
 0x10a   :  { %v253_v53 = vpop.f32.mrb[10].mxu0  ;;  %v277_v54 = vpop.f32.mrb[10].mxu1 }
 0x10b   :  { %343 = vst [vmem:[%s561_s3 + $0x20] sm:$0xff] %v331_v49  ;;  %349 = vst [vmem:[%s561_s3 + $0x50] sm:$0xff] %v337_v50  ;;  %v332_v55 = vadd.f32 %v382_v22, %v253_v53  ;;  %v338_v56 = vadd.f32 %v382_v22, %v277_v54  ;;  %v255_v57 = vpop.f32.mrb[11].mxu0  ;;  %v279_v58 = vpop.f32.mrb[11].mxu1 }
 0x10d   :  { %344 = vst [vmem:[%s561_s3 + $0x28] sm:$0xff] %v332_v55  ;;  %350 = vst [vmem:[%s561_s3 + $0x58] sm:$0xff] %v338_v56 }

// kernel: _resolution_forward.14
= control target key start
LH: loop header
LB: loop body
LE: loop exit
PB: predicated region body
PF: predicated region fallthrough
CT: control target
= control target key end

     0   :  { %vm209_vm0 = vcmask 261120   ;;  %s548_s1 = inlined_call_operand.vmem [shape: bf16[288,128], index: 1, kind: input, shape index: {}]   ;;  %s549_s0 = inlined_call_operand.vmem [shape: bf16[32,288], index: 0, kind: input, shape index: {}]   ;;  %s550_s2 = inlined_call_operand.vmem [shape: f32[1,128], index: 2, kind: input, shape index: {}]   ;;  %s551_s3 = inlined_call_operand.vmem [shape: f32[32,128], index: 3, kind: output, shape index: {}]  }
   0x1   :  { %v415_v0 = vld [vmem:[%s548_s1 + $0x40] sm:$0xff]   ;;  %v417_v2 = vld [vmem:[%s548_s1 + $0x48] sm:$0xff]   ;;  %v419_v4 = vld [vmem:[%s548_s1 + $0x50] sm:$0xff]  }
   0x2   :  { %v416_v1 = vld [vmem:[%s548_s1] sm:$0xff]   ;;  %375 = vmatprep.subr.bf16.mxu0 %v415_v0  ;;  %v418_v3 = vld [vmem:[%s548_s1 + $0x8] sm:$0xff]   ;;  %v420_v5 = vld [vmem:[%s548_s1 + $0x10] sm:$0xff]  }
   0x3   :  { %376 = vmatpush3.bf16.msra.mxu0 %v416_v1  ;;  %v421_v6 = vld [vmem:[%s548_s1 + $0x58] sm:$0xff]   ;;  %v423_v8 = vld [vmem:[%s548_s1 + $0x60] sm:$0xff]   ;;  %v425_v11 = vld [vmem:[%s548_s1 + $0x68] sm:$0xff]  }
   0x4   :  { %377 = vmatprep.subr.bf16.mxu0 %v417_v2  ;;  %v422_v7 = vld [vmem:[%s548_s1 + $0x18] sm:$0xff]   ;;  %v429_v9 = vld [vmem:[%s548_s1 + $0x80] sm:$0xff]   ;;  %v426_v12 = vld [vmem:[%s548_s1 + $0x28] sm:$0xff]  }
   0x5   :  { %v424_v10 = vld [vmem:[%s548_s1 + $0x20] sm:$0xff]   ;;  %407 = vmatprep.subr.bf16.mxu1 %v429_v9  ;;  %v432_v13 = vld [vmem:[%s548_s1 + $0x88] sm:$0xff]   ;;  %v427_v14 = vld [vmem:[%s548_s1 + $0x70] sm:$0xff]  }
   0x6   :  { %408 = vmatpush3.bf16.msra.mxu1 %v429_v9  ;;  %v435_v15 = vld [vmem:[%s549_s0 + $0x4] ss:$12 sps:$4 sm:$0xff]   ;;  %v436_v16 = vld [vmem:[%s549_s0 + $0x8] ss:$12 sps:$4 sm:$0xff]   ;;  %v437_v17 = vld [vmem:[%s549_s0 + $0x20] ss:$12 sps:$4 sm:$0xff]  }
   0x7   :  { %378 = vmatpush3.bf16.msra.mxu0 %v418_v3  ;;  %409 = vmatprep.subr.bf16.mxu1 %v432_v13  ;;  %v428_v18 = vld [vmem:[%s548_s1 + $0x30] sm:$0xff]   ;;  %v430_v19 = vld [vmem:[%s548_s1 + $0x78] sm:$0xff]   ;;  %v433_v21 = vld [vmem:[%s549_s0] ss:$12 sps:$4 sm:$0xff]  }
   0x8   :  { %379 = vmatprep.subr.bf16.mxu0 %v419_v4  ;;  %248 = vmatprep.mubr.bf16.mxu0 %v435_v15  ;;  %v431_v20 = vld [vmem:[%s548_s1 + $0x38] sm:$0xff]   ;;  %v374_v33 = vld [vmem:[%s550_s2] ss:$0 sm:$0xff] }
   0x9   :  { %411 = vmatprep.mubr.msk.bf16.mxu1 %vm209_vm0, %v436_v16  ;;  %v438_v22 = vld [vmem:[%s549_s0 + $0x1c] ss:$12 sps:$4 sm:$0xff]   ;;  %v440_v23 = vld [vmem:[%s549_s0 + $0x18] ss:$12 sps:$4 sm:$0xff]  }
   0xa   :  { %410 = vmatpush3.bf16.msra.mxu1 %v432_v13 }
   0xb   :  { %380 = vmatpush3.bf16.msra.mxu0 %v420_v5 }
   0xc   :  { %381 = vmatprep.subr.bf16.mxu0 %v421_v6 }
   0xd   :  { %412 = vmatmul.mubr.msk.bf16.vlgmr.msra.gmra.mrb[0].mxu1 %vm209_vm0, %v437_v17 }
   0xf   :  { %382 = vmatpush3.bf16.msra.mxu0 %v422_v7 }
  0x10   :  { %383 = vmatprep.subr.bf16.mxu0 %v423_v8 }
  0x13   :  { %384 = vmatpush3.bf16.msra.mxu0 %v424_v10 }
  0x14   :  { %385 = vmatprep.subr.bf16.mxu0 %v425_v11 }
  0x17   :  { %386 = vmatpush3.bf16.msra.mxu0 %v426_v12 }
  0x18   :  { %387 = vmatprep.subr.bf16.mxu0 %v427_v14 }
  0x1b   :  { %388 = vmatpush3.bf16.msra.mxu0 %v428_v18 }
  0x1c   :  { %389 = vmatprep.subr.bf16.mxu0 %v430_v19 }
  0x1f   :  { %390 = vmatpush3.bf16.msra.mxu0 %v431_v20 }
  0x22   :  { %249 = vmatmul.mubr.bf16.vlgmr.msra.gmra.mrb[0].mxu0 %v433_v21 }
  0x23   :  { %256 = vmatprep.mubr.bf16.mxu0 %v438_v22 }
  0x2a   :  { %257 = vmatmul.mubr.bf16.gmra.mrb[4].mxu0 %v440_v23 }
  0xe0   :  { %v413_v24 = vpop.f32.mrb[0].mxu1 }
  0xe1   :  { %v299_v25 = vpop.f32.mrb[1].mxu1 }
  0xe2   :  { %v414_v26 = vpop.f32.mrb[2].mxu1 }
  0xe3   :  { %v302_v27 = vpop.f32.mrb[3].mxu1 }
  0xf5   :  { %v391_v28 = vpop.f32.mrb[0].mxu0 }
  0xf6   :  { %v392_v29 = vpop.f32.mrb[1].mxu0 }
  0xf7   :  { %v393_v30 = vadd.f32 %v392_v29, %v391_v28  ;;  %v394_v31 = vpop.f32.mrb[2].mxu0 }
  0xf8   :  { %v395_v32 = vpop.f32.mrb[3].mxu0 }
  0xf9   :  { %v396_v34 = vadd.f32 %v395_v32, %v394_v31  ;;  %v300_v35 = vadd.f32 %v393_v30, %v299_v25 }
  0xfb   :  { %v336_v36 = vadd.f32 %v374_v33, %v300_v35  ;;  %v303_v37 = vadd.f32 %v396_v34, %v302_v27 }
  0xfd   :  { %340 = vst [vmem:[%s551_s3] sm:$0xff] %v336_v36  ;;  %v337_v38 = vadd.f32 %v374_v33, %v303_v37  ;;  %v397_v39 = vpop.f32.mrb[4].mxu0 }
  0xfe   :  { %v398_v40 = vpop.f32.mrb[5].mxu0 }
  0xff   :  { %341 = vst [vmem:[%s551_s3 + $0x8] sm:$0xff] %v337_v38  ;;  %v399_v41 = vadd.f32 %v398_v40, %v397_v39  ;;  %v400_v42 = vpop.f32.mrb[6].mxu0 }
 0x100   :  { %v401_v43 = vpop.f32.mrb[7].mxu0 }
 0x101   :  { %v308_v44 = vadd.f32 %v413_v24, %v399_v41  ;;  %v402_v45 = vadd.f32 %v401_v43, %v400_v42 }
 0x103   :  { %v338_v46 = vadd.f32 %v374_v33, %v308_v44  ;;  %v311_v47 = vadd.f32 %v414_v26, %v402_v45 }
 0x105   :  { %342 = vst [vmem:[%s551_s3 + $0x10] sm:$0xff] %v338_v46  ;;  %v339_v48 = vadd.f32 %v374_v33, %v311_v47 }
 0x107   :  { %343 = vst [vmem:[%s551_s3 + $0x18] sm:$0xff] %v339_v48 }

// kernel: _resolution_forward.15
= control target key start
LH: loop header
LB: loop body
LE: loop exit
PB: predicated region body
PF: predicated region fallthrough
CT: control target
= control target key end

     0   :  { %vm377_vm0 = vcmask 523264   ;;  %s911_s1 = inlined_call_operand.vmem [shape: bf16[576,128], index: 1, kind: input, shape index: {}]   ;;  %s912_s0 = inlined_call_operand.vmem [shape: bf16[32,576], index: 0, kind: input, shape index: {}]   ;;  %s913_s2 = inlined_call_operand.vmem [shape: f32[1,128], index: 2, kind: input, shape index: {}]   ;;  %s914_s3 = inlined_call_operand.vmem [shape: f32[32,128], index: 3, kind: output, shape index: {}]  }
   0x1   :  { %v688_v0 = vld [vmem:[%s911_s1 + $0x40] sm:$0xff]   ;;  %v692_v4 = vld [vmem:[%s911_s1 + $0x48] sm:$0xff]   ;;  %v696_v8 = vld [vmem:[%s911_s1 + $0x50] sm:$0xff]  }
   0x2   :  { %v689_v1 = vld [vmem:[%s911_s1 + $0xc0] sm:$0xff]   ;;  %614 = vmatprep.subr.bf16.mxu0 %v688_v0  ;;  %v693_v5 = vld [vmem:[%s911_s1 + $0xc8] sm:$0xff]   ;;  %v697_v9 = vld [vmem:[%s911_s1 + $0xd0] sm:$0xff]  }
   0x3   :  { %v690_v2 = vld [vmem:[%s911_s1] sm:$0xff]   ;;  %642 = vmatprep.subr.bf16.mxu1 %v689_v1  ;;  %v694_v6 = vld [vmem:[%s911_s1 + $0x8] sm:$0xff]   ;;  %v698_v10 = vld [vmem:[%s911_s1 + $0x10] sm:$0xff]  }
   0x4   :  { %v691_v3 = vld [vmem:[%s911_s1 + $0x80] sm:$0xff]   ;;  %615 = vmatpush3.bf16.msra.mxu0 %v690_v2  ;;  %v695_v7 = vld [vmem:[%s911_s1 + $0x88] sm:$0xff]   ;;  %v699_v11 = vld [vmem:[%s911_s1 + $0x90] sm:$0xff]  }
   0x5   :  { %643 = vmatpush3.bf16.msra.mxu1 %v691_v3  ;;  %616 = vmatprep.subr.bf16.mxu0 %v692_v4  ;;  %v700_v12 = vld [vmem:[%s911_s1 + $0x58] sm:$0xff]   ;;  %v704_v16 = vld [vmem:[%s911_s1 + $0x60] sm:$0xff]   ;;  %v708_v20 = vld [vmem:[%s911_s1 + $0x68] sm:$0xff]  }
   0x6   :  { %644 = vmatprep.subr.bf16.mxu1 %v693_v5  ;;  %v701_v13 = vld [vmem:[%s911_s1 + $0xd8] sm:$0xff]   ;;  %v705_v17 = vld [vmem:[%s911_s1 + $0xe0] sm:$0xff]   ;;  %v709_v21 = vld [vmem:[%s911_s1 + $0xe8] sm:$0xff]  }
   0x7   :  { %v702_v14 = vld [vmem:[%s911_s1 + $0x18] sm:$0xff]   ;;  %v706_v18 = vld [vmem:[%s911_s1 + $0x20] sm:$0xff]   ;;  %v710_v22 = vld [vmem:[%s911_s1 + $0x28] sm:$0xff]  }
   0x8   :  { %617 = vmatpush3.bf16.msra.mxu0 %v694_v6  ;;  %v703_v15 = vld [vmem:[%s911_s1 + $0x98] sm:$0xff]   ;;  %v707_v19 = vld [vmem:[%s911_s1 + $0xa0] sm:$0xff]   ;;  %v711_v23 = vld [vmem:[%s911_s1 + $0xa8] sm:$0xff]  }
   0x9   :  { %645 = vmatpush3.bf16.msra.mxu1 %v695_v7  ;;  %618 = vmatprep.subr.bf16.mxu0 %v696_v8  ;;  %v712_v24 = vld [vmem:[%s911_s1 + $0x70] sm:$0xff]   ;;  %v716_v28 = vld [vmem:[%s911_s1 + $0x78] sm:$0xff]   ;;  %v725_v35 = vld [vmem:[%s912_s0 + $0xc] ss:$20 sps:$4 sm:$0xff]  }
   0xa   :  { %646 = vmatprep.subr.bf16.mxu1 %v697_v9  ;;  %v713_v25 = vld [vmem:[%s911_s1 + $0xf0] sm:$0xff]   ;;  %v717_v29 = vld [vmem:[%s911_s1 + $0xf8] sm:$0xff]   ;;  %v726_v36 = vld [vmem:[%s911_s1 + $0x100] sm:$0xff]   ;;  %465 = vmatprep.mubr.bf16.mxu1 %v725_v35 }
   0xb   :  { %v714_v26 = vld [vmem:[%s911_s1 + $0x30] sm:$0xff]   ;;  %v718_v30 = vld [vmem:[%s911_s1 + $0x38] sm:$0xff]   ;;  %v727_v37 = vld [vmem:[%s911_s1 + $0x108] sm:$0xff]  }
   0xc   :  { %619 = vmatpush3.bf16.msra.mxu0 %v698_v10  ;;  %v715_v27 = vld [vmem:[%s911_s1 + $0xb0] sm:$0xff]   ;;  %v719_v31 = vld [vmem:[%s911_s1 + $0xb8] sm:$0xff]   ;;  %v728_v38 = vld [vmem:[%s912_s0 + $0x2c] ss:$20 sps:$4 sm:$0xff]  }
   0xd   :  { %647 = vmatpush3.bf16.msra.mxu1 %v699_v11  ;;  %620 = vmatprep.subr.bf16.mxu0 %v700_v12  ;;  %v720_v32 = vld [vmem:[%s912_s0] ss:$20 sps:$4 sm:$0xff]   ;;  %v722_v33 = vld [vmem:[%s912_s0 + $0x4] ss:$20 sps:$4 sm:$0xff]   ;;  %v723_v34 = vld [vmem:[%s912_s0 + $0x8] ss:$20 sps:$4 sm:$0xff]  }
   0xe   :  { %648 = vmatprep.subr.bf16.mxu1 %v701_v13  ;;  %416 = vmatprep.mubr.bf16.mxu0 %v722_v33  ;;  %v730_v39 = vld [vmem:[%s912_s0 + $0x34] ss:$20 sps:$4 sm:$0xff]   ;;  %v733_v42 = vld [vmem:[%s912_s0 + $0x30] ss:$20 sps:$4 sm:$0xff]   ;;  %v735_v44 = vld [vmem:[%s911_s1 + $0x118] sm:$0xff]  }
   0xf   :  { %v732_v40 = vld [vmem:[%s912_s0 + $0x28] ss:$20 sps:$4 sm:$0xff]   ;;  %v734_v41 = vld [vmem:[%s911_s1 + $0x110] sm:$0xff]   ;;  %v737_v45 = vld [vmem:[%s912_s0 + $0x38] ss:$20 sps:$4 sm:$0xff]  }
  0x10   :  { %621 = vmatpush3.bf16.msra.mxu0 %v702_v14  ;;  %v736_v43 = vld [vmem:[%s912_s0 + $0x10] ss:$20 sps:$4 sm:$0xff]   ;;  %v613_v11 = vld [vmem:[%s913_s2] ss:$0 sm:$0xff] }
  0x11   :  { %649 = vmatpush3.bf16.msra.mxu1 %v703_v15  ;;  %622 = vmatprep.subr.bf16.mxu0 %v704_v16 }
  0x12   :  { %650 = vmatprep.subr.bf16.mxu1 %v705_v17 }
  0x14   :  { %623 = vmatpush3.bf16.msra.mxu0 %v706_v18 }
  0x15   :  { %651 = vmatpush3.bf16.msra.mxu1 %v707_v19  ;;  %624 = vmatprep.subr.bf16.mxu0 %v708_v20 }
  0x16   :  { %652 = vmatprep.subr.bf16.mxu1 %v709_v21 }
  0x18   :  { %625 = vmatpush3.bf16.msra.mxu0 %v710_v22 }
  0x19   :  { %653 = vmatpush3.bf16.msra.mxu1 %v711_v23  ;;  %626 = vmatprep.subr.bf16.mxu0 %v712_v24 }
  0x1a   :  { %654 = vmatprep.subr.bf16.mxu1 %v713_v25 }
  0x1c   :  { %627 = vmatpush3.bf16.msra.mxu0 %v714_v26 }
  0x1d   :  { %655 = vmatpush3.bf16.msra.mxu1 %v715_v27  ;;  %628 = vmatprep.subr.bf16.mxu0 %v716_v28 }
  0x1e   :  { %656 = vmatprep.subr.bf16.mxu1 %v717_v29 }
  0x20   :  { %629 = vmatpush3.bf16.msra.mxu0 %v718_v30 }
  0x21   :  { %657 = vmatpush3.bf16.msra.mxu1 %v719_v31  ;;  %676 = vmatprep.subr.bf16.mxu0 %v726_v36 }
  0x23   :  { %417 = vmatmul.mubr.bf16.vlgmr.msra.gmra.mrb[0].mxu0 %v720_v32 }
  0x24   :  { %466 = vmatmul.mubr.bf16.vlgmr.msra.gmra.mrb[0].mxu1 %v723_v34  ;;  %677 = vmatpush3.bf16.msra.mxu0 %v726_v36 }
  0x25   :  { %678 = vmatprep.subr.bf16.mxu0 %v727_v37  ;;  %424 = vmatprep.mubr.bf16.mxu0 %v728_v38 }
  0x26   :  { %473 = vmatprep.mubr.bf16.mxu1 %v730_v39 }
  0x28   :  { %679 = vmatpush3.bf16.msra.mxu0 %v727_v37 }
  0x29   :  { %680 = vmatprep.subr.bf16.mxu0 %v734_v41 }
  0x2b   :  { %425 = vmatmul.mubr.bf16.gmra.mrb[4].mxu0 %v732_v40 }
  0x2c   :  { %474 = vmatmul.mubr.bf16.gmra.mrb[4].mxu1 %v733_v42  ;;  %684 = vmatprep.mubr.msk.bf16.mxu0 %vm377_vm0, %v736_v43 }
  0x2d   :  { %681 = vmatpush3.bf16.msra.mxu0 %v734_v41 }
  0x2e   :  { %682 = vmatprep.subr.bf16.mxu0 %v735_v44 }
  0x31   :  { %683 = vmatpush3.bf16.msra.mxu0 %v735_v44 }
  0x34   :  { %685 = vmatmul.mubr.msk.bf16.vlgmr.msra.gmra.mrb[8].mxu0 %vm377_vm0, %v737_v45 }
  0xf6   :  { %v630_v46 = vpop.f32.mrb[0].mxu0 }
  0xf7   :  { %v658_v47 = vpop.f32.mrb[0].mxu1  ;;  %v631_v48 = vpop.f32.mrb[1].mxu0 }
  0xf8   :  { %v632_v49 = vadd.f32 %v631_v48, %v630_v46  ;;  %v659_v50 = vpop.f32.mrb[1].mxu1  ;;  %v633_v51 = vpop.f32.mrb[2].mxu0 }
  0xf9   :  { %v660_v52 = vadd.f32 %v659_v50, %v658_v47  ;;  %v661_v53 = vpop.f32.mrb[2].mxu1  ;;  %v634_v54 = vpop.f32.mrb[3].mxu0 }
  0xfa   :  { %v635_v55 = vadd.f32 %v634_v54, %v633_v51  ;;  %v662_v56 = vpop.f32.mrb[3].mxu1 }
  0xfb   :  { %v663_v57 = vadd.f32 %v662_v56, %v661_v53  ;;  %v468_v58 = vadd.f32 %v660_v52, %v632_v49 }
  0xfd   :  { %v471_v59 = vadd.f32 %v663_v57, %v635_v55 }
  0xfe   :  { %v636_v60 = vpop.f32.mrb[4].mxu0 }
  0xff   :  { %v664_v61 = vpop.f32.mrb[4].mxu1  ;;  %v637_v62 = vpop.f32.mrb[5].mxu0 }
 0x100   :  { %v638_v63 = vadd.f32 %v637_v62, %v636_v60  ;;  %v665_v0 = vpop.f32.mrb[5].mxu1  ;;  %v639_v1 = vpop.f32.mrb[6].mxu0 }
 0x101   :  { %v666_v2 = vadd.f32 %v665_v0, %v664_v61  ;;  %v667_v3 = vpop.f32.mrb[6].mxu1  ;;  %v640_v4 = vpop.f32.mrb[7].mxu0 }
 0x102   :  { %v641_v5 = vadd.f32 %v640_v4, %v639_v1  ;;  %v668_v6 = vpop.f32.mrb[7].mxu1 }
 0x103   :  { %v669_v7 = vadd.f32 %v668_v6, %v667_v3  ;;  %v476_v8 = vadd.f32 %v666_v2, %v638_v63 }
 0x105   :  { %v479_v9 = vadd.f32 %v669_v7, %v641_v5 }
 0x107   :  { %v686_v10 = vpop.f32.mrb[8].mxu0 }
 0x108   :  { %v525_v12 = vadd.f32 %v686_v10, %v476_v8  ;;  %v516_v13 = vpop.f32.mrb[9].mxu0 }
 0x109   :  { %v517_v14 = vadd.f32 %v516_v13, %v468_v58  ;;  %v687_v15 = vpop.f32.mrb[10].mxu0 }
 0x10a   :  { %v555_v16 = vadd.f32 %v613_v11, %v525_v12  ;;  %v528_v17 = vadd.f32 %v687_v15, %v479_v9  ;;  %v519_v18 = vpop.f32.mrb[11].mxu0 }
 0x10b   :  { %v553_v19 = vadd.f32 %v613_v11, %v517_v14  ;;  %v520_v20 = vadd.f32 %v519_v18, %v471_v59 }
 0x10c   :  { %559 = vst [vmem:[%s914_s3 + $0x10] sm:$0xff] %v555_v16  ;;  %v556_v21 = vadd.f32 %v613_v11, %v528_v17 }
 0x10d   :  { %557 = vst [vmem:[%s914_s3] sm:$0xff] %v553_v19  ;;  %v554_v22 = vadd.f32 %v613_v11, %v520_v20 }
 0x10e   :  { %560 = vst [vmem:[%s914_s3 + $0x18] sm:$0xff] %v556_v21 }
 0x10f   :  { %558 = vst [vmem:[%s914_s3 + $0x8] sm:$0xff] %v554_v22 }

</bundles_post_ra>
